<compile_context>
chip_gen: v7x
topology: tpu7x:2x2x1
jax: 0.10.0
libtpu: 0.0.40
codegen_flags: <defaults>
</compile_context>

<pallas_src>
import functools
import math

import jax
import jax.numpy as jnp
from jax.experimental import pallas as pl
from jax.experimental.pallas import tpu as pltpu


def _cdiv(a, b):
    return -(-a // b)


def _layer_norm(x, gamma, beta, eps=1e-5):
    mu = jnp.mean(x, axis=-1, keepdims=True)
    var = jnp.mean((x - mu) ** 2, axis=-1, keepdims=True)
    return (x - mu) * jax.lax.rsqrt(var + eps) * gamma + beta


def encoder_layer_kernel(
    x_ref, mask_ref,
    wqkv_ref, bqkv_ref, wo_ref, bo_ref,
    g1_ref, be1_ref, w1_ref, b1_ref, w2_ref, b2_ref, g2_ref, be2_ref,
    out_ref,
    h_acc,
    *, num_heads, head_dim, compute_dtype):
    """One grid step = one (batch tile, layer)."""
    l = pl.program_id(1)
    num_layers = pl.num_programs(1)
    TB, S, D = x_ref.shape

    # Load the stack input into the layer-resident activation scratch at the
    # start of each batch tile.
    @pl.when(l == 0)
    def _():
        h_acc[...] = x_ref[...]

    xin = h_acc[...]                               # (TB, S, D) f32
    x2d = xin.reshape(TB * S, D)
    xc = x2d.astype(compute_dtype)

    # Fused full-width QKV projection (bf16 operands, f32 accumulate).
    # The 1/sqrt(dh) scale is already folded into Wq / bq.
    qkv = jnp.dot(xc, wqkv_ref[...],
                  preferred_element_type=jnp.float32) + bqkv_ref[...]
    q = qkv[:, :D]
    k = qkv[:, D:2 * D]
    v = qkv[:, 2 * D:]

    mask = mask_ref[...]                           # (TB, 1, S): 0 / -1e30

    # Per-head attention: only the (S, S) score / PV matmuls iterate heads.
    head_outs = []
    for h in range(num_heads):                     # static loop, static slices
        lo = h * head_dim
        hi = lo + head_dim
        qh = q[:, lo:hi].reshape(TB, S, head_dim).astype(compute_dtype)
        kh = k[:, lo:hi].reshape(TB, S, head_dim).astype(compute_dtype)
        vh = v[:, lo:hi].reshape(TB, S, head_dim).astype(compute_dtype)

        s = jnp.einsum('bqd,bkd->bqk', qh, kh,
                       preferred_element_type=jnp.float32)     # (TB, S, S)
        s = s + mask                                           # key-pad mask
        m = jnp.max(s, axis=-1, keepdims=True)
        p = jnp.exp(s - m)
        p = p * pl.reciprocal(jnp.sum(p, axis=-1, keepdims=True), approx=True)

        oh = jnp.einsum('bqk,bkd->bqd', p.astype(compute_dtype), vh,
                        preferred_element_type=jnp.float32)    # (TB, S, dh)
        head_outs.append(oh.reshape(TB * S, head_dim))

    attn = jnp.concatenate(head_outs, axis=-1)     # (TB*S, D)

    # Single full-width output projection.
    mh = jnp.dot(attn.astype(compute_dtype), wo_ref[...],
                 preferred_element_type=jnp.float32) + bo_ref[...]

    # Residual + LN1, FFN (ReLU), residual + LN2.
    h1 = _layer_norm(x2d + mh, g1_ref[...], be1_ref[...])
    ff = jnp.maximum(
        jnp.dot(h1.astype(compute_dtype), w1_ref[...],
                preferred_element_type=jnp.float32) + b1_ref[...], 0.0)
    ff2 = jnp.dot(ff.astype(compute_dtype), w2_ref[...],
                  preferred_element_type=jnp.float32) + b2_ref[...]
    h2 = _layer_norm(h1 + ff2, g2_ref[...], be2_ref[...])

    h_acc[...] = h2.reshape(TB, S, D)

    # Emit once per batch tile, after the last layer.
    @pl.when(l == num_layers - 1)
    def _():
        out_ref[...] = h2.reshape(TB, S, D)


def prepare_params(params, head_count, compute_dtype=jnp.bfloat16):
    """One-time preprocessing: fuse QKV, fold 1/sqrt(dh), cast weights bf16."""
    (wq, bq, wk, bk, wv, bv, wo, bo,
     g1, be1, w1, b1, w2, b2, g2, be2) = params
    L, D, _ = wq.shape
    dh = D // head_count
    scale = jnp.float32(1.0 / math.sqrt(dh))
    c = compute_dtype
    wqkv = jnp.concatenate([wq * scale, wk, wv], axis=-1).astype(c)   # (L, D, 3D)
    bqkv = jnp.concatenate([bq * scale, bk, bv], axis=-1)[:, None, :]  # (L, 1, 3D)
    return (wqkv, bqkv,
            wo.astype(c), bo[:, None, :],
            g1[:, None, :], be1[:, None, :],
            w1.astype(c), b1[:, None, :],
            w2.astype(c), b2[:, None, :],
            g2[:, None, :], be2[:, None, :])


def encoder_stack(x, padding_mask, prepared, head_count, *,
                  batch_tile=None, compute_dtype=jnp.bfloat16):
    """Runs the full encoder stack in a single fused Pallas kernel."""
    (wqkv, bqkv, wo, bo, g1, be1, w1, b1, w2, b2, g2, be2) = prepared
    B, S, D = x.shape
    L = wqkv.shape[0]
    F = w1.shape[-1]
    H = head_count
    assert D % H == 0
    dh = D // H

    # Sublane-dense sequence axis.
    S_pad = max(8, _cdiv(S, 8) * 8)

    # Batch tiling: amortize per-layer weight DMA over TB rows, but keep at
    # least 2 steps on the parallel grid axis for megacore when possible.
    if batch_tile is None:
        batch_tile = min(B, 8)
        if B >= 2 and _cdiv(B, batch_tile) < 2:
            batch_tile = max(1, B // 2)
    TB = batch_tile
    nB = _cdiv(B, TB)
    B_pad = nB * TB

    # Padded input and additive key-padding mask (0 valid / -1e30 padded).
    xp = jnp.zeros((B_pad, S_pad, D), jnp.float32)
    xp = xp.at[:B, :S, :].set(x.astype(jnp.float32))
    add_mask = jnp.full((B_pad, 1, S_pad), jnp.float32(-1e30))
    add_mask = add_mask.at[:B, 0, :S].set(
        jnp.where(padding_mask > 0, jnp.float32(-1e30), jnp.float32(0.0)))

    kernel = functools.partial(
        encoder_layer_kernel, num_heads=H, head_dim=dh,
        compute_dtype=compute_dtype)

    x_map = lambda b, l: (b, 0, 0)      # per-batch-tile blocks
    w_map = lambda b, l: (l, 0, 0)      # per-layer weight blocks

    in_specs = [
        pl.BlockSpec((TB, S_pad, D), x_map),      # x
        pl.BlockSpec((TB, 1, S_pad), x_map),      # additive mask
        pl.BlockSpec((None, D, 3 * D), w_map),    # wqkv (fused, bf16)
        pl.BlockSpec((None, 1, 3 * D), w_map),    # bqkv
        pl.BlockSpec((None, D, D), w_map),        # wo
        pl.BlockSpec((None, 1, D), w_map),        # bo
        pl.BlockSpec((None, 1, D), w_map),        # g1
        pl.BlockSpec((None, 1, D), w_map),        # be1
        pl.BlockSpec((None, D, F), w_map),        # w1
        pl.BlockSpec((None, 1, F), w_map),        # b1
        pl.BlockSpec((None, F, D), w_map),        # w2
        pl.BlockSpec((None, 1, D), w_map),        # b2
        pl.BlockSpec((None, 1, D), w_map),        # g2
        pl.BlockSpec((None, 1, D), w_map),        # be2
    ]
    args = (xp, add_mask, wqkv, bqkv, wo, bo, g1, be1,
            w1, b1, w2, b2, g2, be2)

    # VMEM budget: double-buffered per-step blocks + resident activation
    # scratch + margin, capped below v7x's 64 MiB physical VMEM.
    per_step = (TB * S_pad * D * 4          # x block
                + TB * S_pad * 4            # mask block
                + TB * S_pad * D * 4)       # out block
    for w in (wqkv, bqkv, wo, bo, g1, be1, w1, b1, w2, b2, g2, be2):
        per_step += math.prod(w.shape[1:]) * w.dtype.itemsize
    scratch_bytes = TB * S_pad * D * 4
    vmem_limit = int(min(56 << 20,
                         max(16 << 20, 2 * per_step + scratch_bytes + (4 << 20))))

    # Advisory cost estimate for the XLA scheduler.
    flops = int(2 * B_pad * L * (4 * S_pad * D * D
                                 + 2 * S_pad * S_pad * D
                                 + 2 * S_pad * D * F))
    transc = int(B_pad * L * H * S_pad * S_pad)
    weight_bytes = sum(w.size * w.dtype.itemsize
                       for w in (wqkv, bqkv, wo, bo, g1, be1,
                                 w1, b1, w2, b2, g2, be2))
    bytes_accessed = int(nB * weight_bytes + 2 * B_pad * S_pad * D * 4)

    out = pl.pallas_call(
        kernel,
        out_shape=jax.ShapeDtypeStruct((B_pad, S_pad, D), jnp.float32),
        grid_spec=pltpu.PrefetchScalarGridSpec(
            num_scalar_prefetch=0,
            grid=(nB, L),
            in_specs=in_specs,
            out_specs=pl.BlockSpec((TB, S_pad, D), x_map),
            scratch_shapes=[
                pltpu.VMEM((TB, S_pad, D), jnp.float32),  # layer-resident acts
            ]),
        compiler_params=pltpu.CompilerParams(
            dimension_semantics=("parallel", "arbitrary"),
            vmem_limit_bytes=vmem_limit),
        cost_estimate=pl.CostEstimate(flops=flops, transcendentals=transc,
                                      bytes_accessed=bytes_accessed),
    )(*args)

    return out[:B, :S, :], padding_mask


# ----------------------------- pure-JAX reference -----------------------------
def encoder_stack_ref(x, padding_mask, prepared, head_count):
    """Mirrors the kernel math (bf16 matmul operands, f32 accumulation)."""
    (wqkv, bqkv, wo, bo, g1, be1, w1, b1, w2, b2, g2, be2) = prepared
    L, D, _ = wqkv.shape
    H = head_count
    dh = D // H
    c = wqkv.dtype
    B, S, _ = x.shape
    add_mask = jnp.where(padding_mask > 0, jnp.float32(-1e30),
                         jnp.float32(0.0))[:, None, None, :]
    out = x.astype(jnp.float32)
    for l in range(L):
        xc = out.astype(c)
        qkv = jnp.einsum('bsd,de->bse', xc, wqkv[l],
                         preferred_element_type=jnp.float32) + bqkv[l]
        q, k, v = qkv[..., :D], qkv[..., D:2 * D], qkv[..., 2 * D:]

        def heads(t):
            return t.reshape(B, S, H, dh).transpose(0, 2, 1, 3).astype(c)

        qh, kh, vh = heads(q), heads(k), heads(v)
        s = jnp.einsum('bhqd,bhkd->bhqk', qh, kh,
                       preferred_element_type=jnp.float32) + add_mask
        p = jax.nn.softmax(s, axis=-1)
        o = jnp.einsum('bhqk,bhkd->bhqd', p.astype(c), vh,
                       preferred_element_type=jnp.float32)
        o = o.transpose(0, 2, 1, 3).reshape(B, S, D)
        mh = jnp.einsum('bsd,de->bse', o.astype(c), wo[l],
                        preferred_element_type=jnp.float32) + bo[l]
        h1 = _layer_norm(out + mh, g1[l], be1[l])
        ff = jnp.maximum(
            jnp.einsum('bsd,df->bsf', h1.astype(c), w1[l],
                       preferred_element_type=jnp.float32) + b1[l], 0.0)
        ff2 = jnp.einsum('bsf,fd->bsd', ff.astype(c), w2[l],
                         preferred_element_type=jnp.float32) + b2[l]
        out = _layer_norm(h1 + ff2, g2[l], be2[l])
    return out, padding_mask


# ------------------------------- param init -----------------------------------
def init_params(key, layers, D, head_count, ffn=1024):
    """Deterministic init; full-width [in, out] weights stacked over layers."""
    def linear(k, fan_in, fan_out):
        kw, kb = jax.random.split(k)
        w = jax.random.normal(kw, (fan_in, fan_out), jnp.float32) / math.sqrt(fan_in)
        b = 0.01 * jax.random.normal(kb, (fan_out,), jnp.float32)
        return w, b

    per_layer = []
    for l in range(layers):
        ks = jax.random.split(jax.random.fold_in(key, l), 6)
        wq, bq = linear(ks[0], D, D)
        wk, bk = linear(ks[1], D, D)
        wv, bv = linear(ks[2], D, D)
        wo, bo = linear(ks[3], D, D)
        w1, b1 = linear(ks[4], D, ffn)
        w2, b2 = linear(ks[5], ffn, D)
        per_layer.append(dict(
            wq=wq, bq=bq, wk=wk, bk=bk, wv=wv, bv=bv, wo=wo, bo=bo,
            g1=jnp.ones((D,), jnp.float32), be1=jnp.zeros((D,), jnp.float32),
            w1=w1, b1=b1, w2=w2, b2=b2,
            g2=jnp.ones((D,), jnp.float32), be2=jnp.zeros((D,), jnp.float32)))

    names = ("wq", "bq", "wk", "bk", "wv", "bv", "wo", "bo",
             "g1", "be1", "w1", "b1", "w2", "b2", "g2", "be2")
    return tuple(jnp.stack([lp[n] for lp in per_layer], axis=0) for n in names)


if __name__ == "__main__":
    B, S, D, H, LAYERS = 2, 8, 32, 4, 2
    key = jax.random.PRNGKey(0)
    kx, kp = jax.random.split(key)
    x = jax.random.normal(kx, (B, S, D), jnp.float32)
    # 1.0 marks padded positions (trailing tokens), 0.0 marks valid tokens.
    padding_mask = jnp.array(
        [[0, 0, 0, 0, 0, 0, 1, 1],
         [0, 0, 0, 0, 0, 0, 0, 1]], jnp.float32)

    params = init_params(kp, LAYERS, D, H)
    prepared = prepare_params(params, H)   # one-time: fuse QKV, fold scale, bf16

    out, _ = encoder_stack(x, padding_mask, prepared, H)
    out = jax.block_until_ready(out)

    ref, _ = encoder_stack_ref(x, padding_mask, prepared, H)
    assert out.shape == (B, S, D)
    err = float(jnp.max(jnp.abs(out - ref)))
    assert err < 2e-2, f"mismatch vs JAX reference: max abs err {err}"

    print("KERNEL_OK")
</pallas_src>

<mosaic_0001>
module attributes {stable_mosaic.version = 11 : i64} {
  func.func @encoder_layer_kernel(%arg0: i32, %arg1: i32, %arg2: memref<1x8x32xf32, #tpu.memory_space<vmem>>, %arg3: memref<1x1x8xf32, #tpu.memory_space<vmem>>, %arg4: memref<1x32x96xbf16, #tpu.memory_space<vmem>>, %arg5: memref<1x1x96xf32, #tpu.memory_space<vmem>>, %arg6: memref<1x32x32xbf16, #tpu.memory_space<vmem>>, %arg7: memref<1x1x32xf32, #tpu.memory_space<vmem>>, %arg8: memref<1x1x32xf32, #tpu.memory_space<vmem>>, %arg9: memref<1x1x32xf32, #tpu.memory_space<vmem>>, %arg10: memref<1x32x1024xbf16, #tpu.memory_space<vmem>>, %arg11: memref<1x1x1024xf32, #tpu.memory_space<vmem>>, %arg12: memref<1x1024x32xbf16, #tpu.memory_space<vmem>>, %arg13: memref<1x1x32xf32, #tpu.memory_space<vmem>>, %arg14: memref<1x1x32xf32, #tpu.memory_space<vmem>>, %arg15: memref<1x1x32xf32, #tpu.memory_space<vmem>>, %arg16: memref<1x8x32xf32, #tpu.memory_space<vmem>>, %arg17: memref<1x8x32xf32, #tpu.memory_space<vmem>>) attributes {dimension_semantics = [#tpu.dimension_semantics<parallel>, #tpu.dimension_semantics<arbitrary>], iteration_bounds = array<i64: 2, 2>, scalar_prefetch = 0 : i64, scratch_operands = 1 : i64, tpu.core_type = #tpu.core_type<tc>, window_params = [{transform_indices = @transform_0, window_bounds = array<i64: 1, 8, 32>}, {transform_indices = @transform_1, window_bounds = array<i64: 1, 1, 8>}, {transform_indices = @transform_2, window_bounds = array<i64: 1, 32, 96>}, {transform_indices = @transform_3, window_bounds = array<i64: 1, 1, 96>}, {transform_indices = @transform_4, window_bounds = array<i64: 1, 32, 32>}, {transform_indices = @transform_5, window_bounds = array<i64: 1, 1, 32>}, {transform_indices = @transform_6, window_bounds = array<i64: 1, 1, 32>}, {transform_indices = @transform_7, window_bounds = array<i64: 1, 1, 32>}, {transform_indices = @transform_8, window_bounds = array<i64: 1, 32, 1024>}, {transform_indices = @transform_9, window_bounds = array<i64: 1, 1, 1024>}, {transform_indices = @transform_10, window_bounds = array<i64: 1, 1024, 32>}, {transform_indices = @transform_11, window_bounds = array<i64: 1, 1, 32>}, {transform_indices = @transform_12, window_bounds = array<i64: 1, 1, 32>}, {transform_indices = @transform_13, window_bounds = array<i64: 1, 1, 32>}, {transform_indices = @transform_14, window_bounds = array<i64: 1, 8, 32>}]} {
    %c0_i32 = arith.constant 0 : i32
    %0 = arith.cmpi eq, %arg1, %c0_i32 : i32
    %1 = arith.extui %0 : i1 to i32
    %c0_i32_0 = arith.constant 0 : i32
    %2 = arith.cmpi ne, %1, %c0_i32_0 : i32
    scf.if %2 {
      %c0_76 = arith.constant 0 : index
      %c0_77 = arith.constant 0 : index
      %c0_78 = arith.constant 0 : index
      %203 = vector.load %arg2[%c0_76, %c0_77, %c0_78] : memref<1x8x32xf32, #tpu.memory_space<vmem>>, vector<1x8x32xf32>
      %c0_79 = arith.constant 0 : index
      %c0_80 = arith.constant 0 : index
      %c0_81 = arith.constant 0 : index
      %204 = vector.load %arg17[%c0_79, %c0_80, %c0_81] : memref<1x8x32xf32, #tpu.memory_space<vmem>>, vector<1x8x32xf32>
      tpu.vector_store %arg17[%c0_79, %c0_80, %c0_81], %203 {strides = array<i32>} : memref<1x8x32xf32, #tpu.memory_space<vmem>>, vector<1x8x32xf32>,
    } else {
    }
    %c0 = arith.constant 0 : index
    %c0_1 = arith.constant 0 : index
    %c0_2 = arith.constant 0 : index
    %3 = vector.load %arg17[%c0, %c0_1, %c0_2] : memref<1x8x32xf32, #tpu.memory_space<vmem>>, vector<1x8x32xf32>
    %4 = vector.shape_cast %3 : vector<1x8x32xf32> to vector<8x32xf32>
    %5 = arith.truncf %4 : vector<8x32xf32> to vector<8x32xbf16>
    %c0_3 = arith.constant 0 : index
    %c0_4 = arith.constant 0 : index
    %c0_5 = arith.constant 0 : index
    %6 = vector.load %arg4[%c0_3, %c0_4, %c0_5] : memref<1x32x96xbf16, #tpu.memory_space<vmem>>, vector<1x32x96xbf16>
    %7 = vector.shape_cast %6 : vector<1x32x96xbf16> to vector<32x96xbf16>
    %cst = arith.constant dense<0.000000e+00> : vector<8x96xf32>
    %8 = tpu.matmul %5, %7, %cst {dimension_numbers = #tpu.dot_dimension_numbers<[1], [0], [0], [1], [0, 0, 1, 1], [], []>} : vector<8x32xbf16>, vector<32x96xbf16>, vector<8x96xf32> -> vector<8x96xf32>
    %c0_6 = arith.constant 0 : index
    %c0_7 = arith.constant 0 : index
    %c0_8 = arith.constant 0 : index
    %9 = vector.load %arg5[%c0_6, %c0_7, %c0_8] : memref<1x1x96xf32, #tpu.memory_space<vmem>>, vector<1x1x96xf32>
    %10 = vector.shape_cast %9 : vector<1x1x96xf32> to vector<1x96xf32>
    %11 = vector.broadcast %10 : vector<1x96xf32> to vector<8x96xf32>
    %12 = arith.addf %8, %11 : vector<8x96xf32>
    %13 = vector.extract_strided_slice %12 {offsets = [0, 0], sizes = [8, 32], strides = [1, 1]} : vector<8x96xf32> to vector<8x32xf32>
    %14 = vector.extract_strided_slice %12 {offsets = [0, 32], sizes = [8, 32], strides = [1, 1]} : vector<8x96xf32> to vector<8x32xf32>
    %15 = vector.extract_strided_slice %12 {offsets = [0, 64], sizes = [8, 32], strides = [1, 1]} : vector<8x96xf32> to vector<8x32xf32>
    %c0_9 = arith.constant 0 : index
    %c0_10 = arith.constant 0 : index
    %c0_11 = arith.constant 0 : index
    %16 = vector.load %arg3[%c0_9, %c0_10, %c0_11] : memref<1x1x8xf32, #tpu.memory_space<vmem>>, vector<1x1x8xf32>
    %17 = vector.extract_strided_slice %13 {offsets = [0, 0], sizes = [8, 8], strides = [1, 1]} : vector<8x32xf32> to vector<8x8xf32>
    %18 = vector.shape_cast %17 : vector<8x8xf32> to vector<1x8x8xf32>
    %19 = arith.truncf %18 : vector<1x8x8xf32> to vector<1x8x8xbf16>
    %20 = vector.extract_strided_slice %14 {offsets = [0, 0], sizes = [8, 8], strides = [1, 1]} : vector<8x32xf32> to vector<8x8xf32>
    %21 = vector.shape_cast %20 : vector<8x8xf32> to vector<1x8x8xf32>
    %22 = arith.truncf %21 : vector<1x8x8xf32> to vector<1x8x8xbf16>
    %23 = vector.extract_strided_slice %15 {offsets = [0, 0], sizes = [8, 8], strides = [1, 1]} : vector<8x32xf32> to vector<8x8xf32>
    %24 = vector.shape_cast %23 : vector<8x8xf32> to vector<1x8x8xf32>
    %25 = arith.truncf %24 : vector<1x8x8xf32> to vector<1x8x8xbf16>
    "tpu.trace_start"() <{level = 10 : i32, message = "bqd,bkd->bqk"}> : () -> ()
    %cst_12 = arith.constant dense<0.000000e+00> : vector<1x8x8xf32>
    %26 = tpu.matmul %19, %22, %cst_12 {dimension_numbers = #tpu.dot_dimension_numbers<[2], [2], [1], [1], [0, 0, 0, 1, 1, 1], [0], [0]>} : vector<1x8x8xbf16>, vector<1x8x8xbf16>, vector<1x8x8xf32> -> vector<1x8x8xf32>
    "tpu.trace_stop"() : () -> ()
    %27 = vector.broadcast %16 : vector<1x1x8xf32> to vector<1x8x8xf32>
    %28 = arith.addf %26, %27 : vector<1x8x8xf32>
    %cst_13 = arith.constant dense<0xFF800000> : vector<1x8xf32>
    %29 = vector.multi_reduction <maximumf>, %28, %cst_13 [2] : vector<1x8x8xf32> to vector<1x8xf32>
    %30 = vector.shape_cast %29 : vector<1x8xf32> to vector<1x8x1xf32>
    %31 = vector.broadcast %30 : vector<1x8x1xf32> to vector<1x8x8xf32>
    %32 = arith.subf %28, %31 : vector<1x8x8xf32>
    %33 = math.exp %32 : vector<1x8x8xf32>
    %cst_14 = arith.constant dense<0.000000e+00> : vector<1x8xf32>
    %34 = vector.multi_reduction <add>, %33, %cst_14 [2] : vector<1x8x8xf32> to vector<1x8xf32>
    %35 = vector.shape_cast %34 : vector<1x8xf32> to vector<1x8x1xf32>
    %36 = tpu.reciprocal %35 {approx = true} : vector<1x8x1xf32> -> vector<1x8x1xf32>
    %37 = vector.broadcast %36 : vector<1x8x1xf32> to vector<1x8x8xf32>
    %38 = arith.mulf %33, %37 : vector<1x8x8xf32>
    %39 = arith.truncf %38 : vector<1x8x8xf32> to vector<1x8x8xbf16>
    "tpu.trace_start"() <{level = 10 : i32, message = "bqk,bkd->bqd"}> : () -> ()
    %cst_15 = arith.constant dense<0.000000e+00> : vector<1x8x8xf32>
    %40 = tpu.matmul %39, %25, %cst_15 {dimension_numbers = #tpu.dot_dimension_numbers<[2], [1], [1], [2], [0, 0, 0, 1, 1, 2], [0], [0]>} : vector<1x8x8xbf16>, vector<1x8x8xbf16>, vector<1x8x8xf32> -> vector<1x8x8xf32>
    "tpu.trace_stop"() : () -> ()
    %41 = vector.shape_cast %40 : vector<1x8x8xf32> to vector<8x8xf32>
    %42 = vector.extract_strided_slice %13 {offsets = [0, 8], sizes = [8, 8], strides = [1, 1]} : vector<8x32xf32> to vector<8x8xf32>
    %43 = vector.shape_cast %42 : vector<8x8xf32> to vector<1x8x8xf32>
    %44 = arith.truncf %43 : vector<1x8x8xf32> to vector<1x8x8xbf16>
    %45 = vector.extract_strided_slice %14 {offsets = [0, 8], sizes = [8, 8], strides = [1, 1]} : vector<8x32xf32> to vector<8x8xf32>
    %46 = vector.shape_cast %45 : vector<8x8xf32> to vector<1x8x8xf32>
    %47 = arith.truncf %46 : vector<1x8x8xf32> to vector<1x8x8xbf16>
    %48 = vector.extract_strided_slice %15 {offsets = [0, 8], sizes = [8, 8], strides = [1, 1]} : vector<8x32xf32> to vector<8x8xf32>
    %49 = vector.shape_cast %48 : vector<8x8xf32> to vector<1x8x8xf32>
    %50 = arith.truncf %49 : vector<1x8x8xf32> to vector<1x8x8xbf16>
    "tpu.trace_start"() <{level = 10 : i32, message = "bqd,bkd->bqk"}> : () -> ()
    %cst_16 = arith.constant dense<0.000000e+00> : vector<1x8x8xf32>
    %51 = tpu.matmul %44, %47, %cst_16 {dimension_numbers = #tpu.dot_dimension_numbers<[2], [2], [1], [1], [0, 0, 0, 1, 1, 1], [0], [0]>} : vector<1x8x8xbf16>, vector<1x8x8xbf16>, vector<1x8x8xf32> -> vector<1x8x8xf32>
    "tpu.trace_stop"() : () -> ()
    %52 = vector.broadcast %16 : vector<1x1x8xf32> to vector<1x8x8xf32>
    %53 = arith.addf %51, %52 : vector<1x8x8xf32>
    %cst_17 = arith.constant dense<0xFF800000> : vector<1x8xf32>
    %54 = vector.multi_reduction <maximumf>, %53, %cst_17 [2] : vector<1x8x8xf32> to vector<1x8xf32>
    %55 = vector.shape_cast %54 : vector<1x8xf32> to vector<1x8x1xf32>
    %56 = vector.broadcast %55 : vector<1x8x1xf32> to vector<1x8x8xf32>
    %57 = arith.subf %53, %56 : vector<1x8x8xf32>
    %58 = math.exp %57 : vector<1x8x8xf32>
    %cst_18 = arith.constant dense<0.000000e+00> : vector<1x8xf32>
    %59 = vector.multi_reduction <add>, %58, %cst_18 [2] : vector<1x8x8xf32> to vector<1x8xf32>
    %60 = vector.shape_cast %59 : vector<1x8xf32> to vector<1x8x1xf32>
    %61 = tpu.reciprocal %60 {approx = true} : vector<1x8x1xf32> -> vector<1x8x1xf32>
    %62 = vector.broadcast %61 : vector<1x8x1xf32> to vector<1x8x8xf32>
    %63 = arith.mulf %58, %62 : vector<1x8x8xf32>
    %64 = arith.truncf %63 : vector<1x8x8xf32> to vector<1x8x8xbf16>
    "tpu.trace_start"() <{level = 10 : i32, message = "bqk,bkd->bqd"}> : () -> ()
    %cst_19 = arith.constant dense<0.000000e+00> : vector<1x8x8xf32>
    %65 = tpu.matmul %64, %50, %cst_19 {dimension_numbers = #tpu.dot_dimension_numbers<[2], [1], [1], [2], [0, 0, 0, 1, 1, 2], [0], [0]>} : vector<1x8x8xbf16>, vector<1x8x8xbf16>, vector<1x8x8xf32> -> vector<1x8x8xf32>
    "tpu.trace_stop"() : () -> ()
    %66 = vector.shape_cast %65 : vector<1x8x8xf32> to vector<8x8xf32>
    %67 = vector.extract_strided_slice %13 {offsets = [0, 16], sizes = [8, 8], strides = [1, 1]} : vector<8x32xf32> to vector<8x8xf32>
    %68 = vector.shape_cast %67 : vector<8x8xf32> to vector<1x8x8xf32>
    %69 = arith.truncf %68 : vector<1x8x8xf32> to vector<1x8x8xbf16>
    %70 = vector.extract_strided_slice %14 {offsets = [0, 16], sizes = [8, 8], strides = [1, 1]} : vector<8x32xf32> to vector<8x8xf32>
    %71 = vector.shape_cast %70 : vector<8x8xf32> to vector<1x8x8xf32>
    %72 = arith.truncf %71 : vector<1x8x8xf32> to vector<1x8x8xbf16>
    %73 = vector.extract_strided_slice %15 {offsets = [0, 16], sizes = [8, 8], strides = [1, 1]} : vector<8x32xf32> to vector<8x8xf32>
    %74 = vector.shape_cast %73 : vector<8x8xf32> to vector<1x8x8xf32>
    %75 = arith.truncf %74 : vector<1x8x8xf32> to vector<1x8x8xbf16>
    "tpu.trace_start"() <{level = 10 : i32, message = "bqd,bkd->bqk"}> : () -> ()
    %cst_20 = arith.constant dense<0.000000e+00> : vector<1x8x8xf32>
    %76 = tpu.matmul %69, %72, %cst_20 {dimension_numbers = #tpu.dot_dimension_numbers<[2], [2], [1], [1], [0, 0, 0, 1, 1, 1], [0], [0]>} : vector<1x8x8xbf16>, vector<1x8x8xbf16>, vector<1x8x8xf32> -> vector<1x8x8xf32>
    "tpu.trace_stop"() : () -> ()
    %77 = vector.broadcast %16 : vector<1x1x8xf32> to vector<1x8x8xf32>
    %78 = arith.addf %76, %77 : vector<1x8x8xf32>
    %cst_21 = arith.constant dense<0xFF800000> : vector<1x8xf32>
    %79 = vector.multi_reduction <maximumf>, %78, %cst_21 [2] : vector<1x8x8xf32> to vector<1x8xf32>
    %80 = vector.shape_cast %79 : vector<1x8xf32> to vector<1x8x1xf32>
    %81 = vector.broadcast %80 : vector<1x8x1xf32> to vector<1x8x8xf32>
    %82 = arith.subf %78, %81 : vector<1x8x8xf32>
    %83 = math.exp %82 : vector<1x8x8xf32>
    %cst_22 = arith.constant dense<0.000000e+00> : vector<1x8xf32>
    %84 = vector.multi_reduction <add>, %83, %cst_22 [2] : vector<1x8x8xf32> to vector<1x8xf32>
    %85 = vector.shape_cast %84 : vector<1x8xf32> to vector<1x8x1xf32>
    %86 = tpu.reciprocal %85 {approx = true} : vector<1x8x1xf32> -> vector<1x8x1xf32>
    %87 = vector.broadcast %86 : vector<1x8x1xf32> to vector<1x8x8xf32>
    %88 = arith.mulf %83, %87 : vector<1x8x8xf32>
    %89 = arith.truncf %88 : vector<1x8x8xf32> to vector<1x8x8xbf16>
    "tpu.trace_start"() <{level = 10 : i32, message = "bqk,bkd->bqd"}> : () -> ()
    %cst_23 = arith.constant dense<0.000000e+00> : vector<1x8x8xf32>
    %90 = tpu.matmul %89, %75, %cst_23 {dimension_numbers = #tpu.dot_dimension_numbers<[2], [1], [1], [2], [0, 0, 0, 1, 1, 2], [0], [0]>} : vector<1x8x8xbf16>, vector<1x8x8xbf16>, vector<1x8x8xf32> -> vector<1x8x8xf32>
    "tpu.trace_stop"() : () -> ()
    %91 = vector.shape_cast %90 : vector<1x8x8xf32> to vector<8x8xf32>
    %92 = vector.extract_strided_slice %13 {offsets = [0, 24], sizes = [8, 8], strides = [1, 1]} : vector<8x32xf32> to vector<8x8xf32>
    %93 = vector.shape_cast %92 : vector<8x8xf32> to vector<1x8x8xf32>
    %94 = arith.truncf %93 : vector<1x8x8xf32> to vector<1x8x8xbf16>
    %95 = vector.extract_strided_slice %14 {offsets = [0, 24], sizes = [8, 8], strides = [1, 1]} : vector<8x32xf32> to vector<8x8xf32>
    %96 = vector.shape_cast %95 : vector<8x8xf32> to vector<1x8x8xf32>
    %97 = arith.truncf %96 : vector<1x8x8xf32> to vector<1x8x8xbf16>
    %98 = vector.extract_strided_slice %15 {offsets = [0, 24], sizes = [8, 8], strides = [1, 1]} : vector<8x32xf32> to vector<8x8xf32>
    %99 = vector.shape_cast %98 : vector<8x8xf32> to vector<1x8x8xf32>
    %100 = arith.truncf %99 : vector<1x8x8xf32> to vector<1x8x8xbf16>
    "tpu.trace_start"() <{level = 10 : i32, message = "bqd,bkd->bqk"}> : () -> ()
    %cst_24 = arith.constant dense<0.000000e+00> : vector<1x8x8xf32>
    %101 = tpu.matmul %94, %97, %cst_24 {dimension_numbers = #tpu.dot_dimension_numbers<[2], [2], [1], [1], [0, 0, 0, 1, 1, 1], [0], [0]>} : vector<1x8x8xbf16>, vector<1x8x8xbf16>, vector<1x8x8xf32> -> vector<1x8x8xf32>
    "tpu.trace_stop"() : () -> ()
    %102 = vector.broadcast %16 : vector<1x1x8xf32> to vector<1x8x8xf32>
    %103 = arith.addf %101, %102 : vector<1x8x8xf32>
    %cst_25 = arith.constant dense<0xFF800000> : vector<1x8xf32>
    %104 = vector.multi_reduction <maximumf>, %103, %cst_25 [2] : vector<1x8x8xf32> to vector<1x8xf32>
    %105 = vector.shape_cast %104 : vector<1x8xf32> to vector<1x8x1xf32>
    %106 = vector.broadcast %105 : vector<1x8x1xf32> to vector<1x8x8xf32>
    %107 = arith.subf %103, %106 : vector<1x8x8xf32>
    %108 = math.exp %107 : vector<1x8x8xf32>
    %cst_26 = arith.constant dense<0.000000e+00> : vector<1x8xf32>
    %109 = vector.multi_reduction <add>, %108, %cst_26 [2] : vector<1x8x8xf32> to vector<1x8xf32>
    %110 = vector.shape_cast %109 : vector<1x8xf32> to vector<1x8x1xf32>
    %111 = tpu.reciprocal %110 {approx = true} : vector<1x8x1xf32> -> vector<1x8x1xf32>
    %112 = vector.broadcast %111 : vector<1x8x1xf32> to vector<1x8x8xf32>
    %113 = arith.mulf %108, %112 : vector<1x8x8xf32>
    %114 = arith.truncf %113 : vector<1x8x8xf32> to vector<1x8x8xbf16>
    "tpu.trace_start"() <{level = 10 : i32, message = "bqk,bkd->bqd"}> : () -> ()
    %cst_27 = arith.constant dense<0.000000e+00> : vector<1x8x8xf32>
    %115 = tpu.matmul %114, %100, %cst_27 {dimension_numbers = #tpu.dot_dimension_numbers<[2], [1], [1], [2], [0, 0, 0, 1, 1, 2], [0], [0]>} : vector<1x8x8xbf16>, vector<1x8x8xbf16>, vector<1x8x8xf32> -> vector<1x8x8xf32>
    "tpu.trace_stop"() : () -> ()
    %116 = vector.shape_cast %115 : vector<1x8x8xf32> to vector<8x8xf32>
    %117 = tpu.concatenate %41, %66, %91, %116 in 1 : vector<8x8xf32>, vector<8x8xf32>, vector<8x8xf32>, vector<8x8xf32> -> vector<8x32xf32>
    %118 = arith.truncf %117 : vector<8x32xf32> to vector<8x32xbf16>
    %c0_28 = arith.constant 0 : index
    %c0_29 = arith.constant 0 : index
    %c0_30 = arith.constant 0 : index
    %119 = vector.load %arg6[%c0_28, %c0_29, %c0_30] : memref<1x32x32xbf16, #tpu.memory_space<vmem>>, vector<1x32x32xbf16>
    %120 = vector.shape_cast %119 : vector<1x32x32xbf16> to vector<32x32xbf16>
    %cst_31 = arith.constant dense<0.000000e+00> : vector<8x32xf32>
    %121 = tpu.matmul %118, %120, %cst_31 {dimension_numbers = #tpu.dot_dimension_numbers<[1], [0], [0], [1], [0, 0, 1, 1], [], []>} : vector<8x32xbf16>, vector<32x32xbf16>, vector<8x32xf32> -> vector<8x32xf32>
    %c0_32 = arith.constant 0 : index
    %c0_33 = arith.constant 0 : index
    %c0_34 = arith.constant 0 : index
    %122 = vector.load %arg7[%c0_32, %c0_33, %c0_34] : memref<1x1x32xf32, #tpu.memory_space<vmem>>, vector<1x1x32xf32>
    %123 = vector.shape_cast %122 : vector<1x1x32xf32> to vector<1x32xf32>
    %124 = vector.broadcast %123 : vector<1x32xf32> to vector<8x32xf32>
    %125 = arith.addf %121, %124 : vector<8x32xf32>
    %126 = arith.addf %4, %125 : vector<8x32xf32>
    %c0_35 = arith.constant 0 : index
    %c0_36 = arith.constant 0 : index
    %c0_37 = arith.constant 0 : index
    %127 = vector.load %arg8[%c0_35, %c0_36, %c0_37] : memref<1x1x32xf32, #tpu.memory_space<vmem>>, vector<1x1x32xf32>
    %128 = vector.shape_cast %127 : vector<1x1x32xf32> to vector<1x32xf32>
    %c0_38 = arith.constant 0 : index
    %c0_39 = arith.constant 0 : index
    %c0_40 = arith.constant 0 : index
    %129 = vector.load %arg9[%c0_38, %c0_39, %c0_40] : memref<1x1x32xf32, #tpu.memory_space<vmem>>, vector<1x1x32xf32>
    %130 = vector.shape_cast %129 : vector<1x1x32xf32> to vector<1x32xf32>
    %cst_41 = arith.constant dense<0.000000e+00> : vector<8xf32>
    %131 = vector.multi_reduction <add>, %126, %cst_41 [1] : vector<8x32xf32> to vector<8xf32>
    %132 = vector.shape_cast %131 : vector<8xf32> to vector<8x1xf32>
    %cst_42 = arith.constant 3.200000e+01 : f32
    %133 = vector.broadcast %cst_42 : f32 to vector<8x1xf32>
    %134 = arith.divf %132, %133 : vector<8x1xf32>
    %135 = vector.broadcast %134 : vector<8x1xf32> to vector<8x32xf32>
    %136 = arith.subf %126, %135 : vector<8x32xf32>
    %137 = arith.mulf %136, %136 : vector<8x32xf32>
    %cst_43 = arith.constant dense<0.000000e+00> : vector<8xf32>
    %138 = vector.multi_reduction <add>, %137, %cst_43 [1] : vector<8x32xf32> to vector<8xf32>
    %139 = vector.shape_cast %138 : vector<8xf32> to vector<8x1xf32>
    %cst_44 = arith.constant 3.200000e+01 : f32
    %140 = vector.broadcast %cst_44 : f32 to vector<8x1xf32>
    %141 = arith.divf %139, %140 : vector<8x1xf32>
    %142 = vector.broadcast %134 : vector<8x1xf32> to vector<8x32xf32>
    %143 = arith.subf %126, %142 : vector<8x32xf32>
    %cst_45 = arith.constant 9.99999974E-6 : f32
    %144 = vector.broadcast %cst_45 : f32 to vector<8x1xf32>
    %145 = arith.addf %141, %144 : vector<8x1xf32>
    %146 = math.rsqrt %145 : vector<8x1xf32>
    %147 = vector.broadcast %146 : vector<8x1xf32> to vector<8x32xf32>
    %148 = arith.mulf %143, %147 : vector<8x32xf32>
    %149 = vector.broadcast %128 : vector<1x32xf32> to vector<8x32xf32>
    %150 = arith.mulf %148, %149 : vector<8x32xf32>
    %151 = vector.broadcast %130 : vector<1x32xf32> to vector<8x32xf32>
    %152 = arith.addf %150, %151 : vector<8x32xf32>
    %153 = arith.truncf %152 : vector<8x32xf32> to vector<8x32xbf16>
    %c0_46 = arith.constant 0 : index
    %c0_47 = arith.constant 0 : index
    %c0_48 = arith.constant 0 : index
    %154 = vector.load %arg10[%c0_46, %c0_47, %c0_48] : memref<1x32x1024xbf16, #tpu.memory_space<vmem>>, vector<1x32x1024xbf16>
    %155 = vector.shape_cast %154 : vector<1x32x1024xbf16> to vector<32x1024xbf16>
    %cst_49 = arith.constant dense<0.000000e+00> : vector<8x1024xf32>
    %156 = tpu.matmul %153, %155, %cst_49 {dimension_numbers = #tpu.dot_dimension_numbers<[1], [0], [0], [1], [0, 0, 1, 1], [], []>} : vector<8x32xbf16>, vector<32x1024xbf16>, vector<8x1024xf32> -> vector<8x1024xf32>
    %c0_50 = arith.constant 0 : index
    %c0_51 = arith.constant 0 : index
    %c0_52 = arith.constant 0 : index
    %157 = vector.load %arg11[%c0_50, %c0_51, %c0_52] : memref<1x1x1024xf32, #tpu.memory_space<vmem>>, vector<1x1x1024xf32>
    %158 = vector.shape_cast %157 : vector<1x1x1024xf32> to vector<1x1024xf32>
    %159 = vector.broadcast %158 : vector<1x1024xf32> to vector<8x1024xf32>
    %160 = arith.addf %156, %159 : vector<8x1024xf32>
    %cst_53 = arith.constant 0.000000e+00 : f32
    %161 = vector.broadcast %cst_53 : f32 to vector<8x1024xf32>
    %162 = arith.maximumf %160, %161 : vector<8x1024xf32>
    %163 = arith.truncf %162 : vector<8x1024xf32> to vector<8x1024xbf16>
    %c0_54 = arith.constant 0 : index
    %c0_55 = arith.constant 0 : index
    %c0_56 = arith.constant 0 : index
    %164 = vector.load %arg12[%c0_54, %c0_55, %c0_56] : memref<1x1024x32xbf16, #tpu.memory_space<vmem>>, vector<1x1024x32xbf16>
    %165 = vector.shape_cast %164 : vector<1x1024x32xbf16> to vector<1024x32xbf16>
    %cst_57 = arith.constant dense<0.000000e+00> : vector<8x32xf32>
    %166 = tpu.matmul %163, %165, %cst_57 {dimension_numbers = #tpu.dot_dimension_numbers<[1], [0], [0], [1], [0, 0, 1, 1], [], []>} : vector<8x1024xbf16>, vector<1024x32xbf16>, vector<8x32xf32> -> vector<8x32xf32>
    %c0_58 = arith.constant 0 : index
    %c0_59 = arith.constant 0 : index
    %c0_60 = arith.constant 0 : index
    %167 = vector.load %arg13[%c0_58, %c0_59, %c0_60] : memref<1x1x32xf32, #tpu.memory_space<vmem>>, vector<1x1x32xf32>
    %168 = vector.shape_cast %167 : vector<1x1x32xf32> to vector<1x32xf32>
    %169 = vector.broadcast %168 : vector<1x32xf32> to vector<8x32xf32>
    %170 = arith.addf %166, %169 : vector<8x32xf32>
    %171 = arith.addf %152, %170 : vector<8x32xf32>
    %c0_61 = arith.constant 0 : index
    %c0_62 = arith.constant 0 : index
    %c0_63 = arith.constant 0 : index
    %172 = vector.load %arg14[%c0_61, %c0_62, %c0_63] : memref<1x1x32xf32, #tpu.memory_space<vmem>>, vector<1x1x32xf32>
    %173 = vector.shape_cast %172 : vector<1x1x32xf32> to vector<1x32xf32>
    %c0_64 = arith.constant 0 : index
    %c0_65 = arith.constant 0 : index
    %c0_66 = arith.constant 0 : index
    %174 = vector.load %arg15[%c0_64, %c0_65, %c0_66] : memref<1x1x32xf32, #tpu.memory_space<vmem>>, vector<1x1x32xf32>
    %175 = vector.shape_cast %174 : vector<1x1x32xf32> to vector<1x32xf32>
    %cst_67 = arith.constant dense<0.000000e+00> : vector<8xf32>
    %176 = vector.multi_reduction <add>, %171, %cst_67 [1] : vector<8x32xf32> to vector<8xf32>
    %177 = vector.shape_cast %176 : vector<8xf32> to vector<8x1xf32>
    %cst_68 = arith.constant 3.200000e+01 : f32
    %178 = vector.broadcast %cst_68 : f32 to vector<8x1xf32>
    %179 = arith.divf %177, %178 : vector<8x1xf32>
    %180 = vector.broadcast %179 : vector<8x1xf32> to vector<8x32xf32>
    %181 = arith.subf %171, %180 : vector<8x32xf32>
    %182 = arith.mulf %181, %181 : vector<8x32xf32>
    %cst_69 = arith.constant dense<0.000000e+00> : vector<8xf32>
    %183 = vector.multi_reduction <add>, %182, %cst_69 [1] : vector<8x32xf32> to vector<8xf32>
    %184 = vector.shape_cast %183 : vector<8xf32> to vector<8x1xf32>
    %cst_70 = arith.constant 3.200000e+01 : f32
    %185 = vector.broadcast %cst_70 : f32 to vector<8x1xf32>
    %186 = arith.divf %184, %185 : vector<8x1xf32>
    %187 = vector.broadcast %179 : vector<8x1xf32> to vector<8x32xf32>
    %188 = arith.subf %171, %187 : vector<8x32xf32>
    %cst_71 = arith.constant 9.99999974E-6 : f32
    %189 = vector.broadcast %cst_71 : f32 to vector<8x1xf32>
    %190 = arith.addf %186, %189 : vector<8x1xf32>
    %191 = math.rsqrt %190 : vector<8x1xf32>
    %192 = vector.broadcast %191 : vector<8x1xf32> to vector<8x32xf32>
    %193 = arith.mulf %188, %192 : vector<8x32xf32>
    %194 = vector.broadcast %173 : vector<1x32xf32> to vector<8x32xf32>
    %195 = arith.mulf %193, %194 : vector<8x32xf32>
    %196 = vector.broadcast %175 : vector<1x32xf32> to vector<8x32xf32>
    %197 = arith.addf %195, %196 : vector<8x32xf32>
    %198 = vector.shape_cast %197 : vector<8x32xf32> to vector<1x8x32xf32>
    %c0_72 = arith.constant 0 : index
    %c0_73 = arith.constant 0 : index
    %c0_74 = arith.constant 0 : index
    %199 = vector.load %arg17[%c0_72, %c0_73, %c0_74] : memref<1x8x32xf32, #tpu.memory_space<vmem>>, vector<1x8x32xf32>
    tpu.vector_store %arg17[%c0_72, %c0_73, %c0_74], %198 {strides = array<i32>} : memref<1x8x32xf32, #tpu.memory_space<vmem>>, vector<1x8x32xf32>,
    %c1_i32 = arith.constant 1 : i32
    %200 = arith.cmpi eq, %arg1, %c1_i32 : i32
    %201 = arith.extui %200 : i1 to i32
    %c0_i32_75 = arith.constant 0 : i32
    %202 = arith.cmpi ne, %201, %c0_i32_75 : i32
    scf.if %202 {
      %203 = vector.shape_cast %197 : vector<8x32xf32> to vector<1x8x32xf32>
      %c0_76 = arith.constant 0 : index
      %c0_77 = arith.constant 0 : index
      %c0_78 = arith.constant 0 : index
      %204 = vector.load %arg16[%c0_76, %c0_77, %c0_78] : memref<1x8x32xf32, #tpu.memory_space<vmem>>, vector<1x8x32xf32>
      tpu.vector_store %arg16[%c0_76, %c0_77, %c0_78], %203 {strides = array<i32>} : memref<1x8x32xf32, #tpu.memory_space<vmem>>, vector<1x8x32xf32>,
    } else {
    }
    return
  }
  func.func @transform_0(%arg0: i32, %arg1: i32) -> (i32, i32, i32) {
    %c0_i32 = arith.constant 0 : i32
    %c0_i32_0 = arith.constant 0 : i32
    %c0_i32_1 = arith.constant 0 : i32
    return %arg0, %c0_i32, %c0_i32_0 : i32, i32, i32
  }
  func.func @transform_1(%arg0: i32, %arg1: i32) -> (i32, i32, i32) {
    %c0_i32 = arith.constant 0 : i32
    %c0_i32_0 = arith.constant 0 : i32
    %c0_i32_1 = arith.constant 0 : i32
    return %arg0, %c0_i32, %c0_i32_0 : i32, i32, i32
  }
  func.func @transform_2(%arg0: i32, %arg1: i32) -> (i32, i32, i32) {
    %c0_i32 = arith.constant 0 : i32
    %c0_i32_0 = arith.constant 0 : i32
    %c0_i32_1 = arith.constant 0 : i32
    return %arg1, %c0_i32, %c0_i32_0 : i32, i32, i32
  }
  func.func @transform_3(%arg0: i32, %arg1: i32) -> (i32, i32, i32) {
    %c0_i32 = arith.constant 0 : i32
    %c0_i32_0 = arith.constant 0 : i32
    %c0_i32_1 = arith.constant 0 : i32
    return %arg1, %c0_i32, %c0_i32_0 : i32, i32, i32
  }
  func.func @transform_4(%arg0: i32, %arg1: i32) -> (i32, i32, i32) {
    %c0_i32 = arith.constant 0 : i32
    %c0_i32_0 = arith.constant 0 : i32
    %c0_i32_1 = arith.constant 0 : i32
    return %arg1, %c0_i32, %c0_i32_0 : i32, i32, i32
  }
  func.func @transform_5(%arg0: i32, %arg1: i32) -> (i32, i32, i32) {
    %c0_i32 = arith.constant 0 : i32
    %c0_i32_0 = arith.constant 0 : i32
    %c0_i32_1 = arith.constant 0 : i32
    return %arg1, %c0_i32, %c0_i32_0 : i32, i32, i32
  }
  func.func @transform_6(%arg0: i32, %arg1: i32) -> (i32, i32, i32) {
    %c0_i32 = arith.constant 0 : i32
    %c0_i32_0 = arith.constant 0 : i32
    %c0_i32_1 = arith.constant 0 : i32
    return %arg1, %c0_i32, %c0_i32_0 : i32, i32, i32
  }
  func.func @transform_7(%arg0: i32, %arg1: i32) -> (i32, i32, i32) {
    %c0_i32 = arith.constant 0 : i32
    %c0_i32_0 = arith.constant 0 : i32
    %c0_i32_1 = arith.constant 0 : i32
    return %arg1, %c0_i32, %c0_i32_0 : i32, i32, i32
  }
  func.func @transform_8(%arg0: i32, %arg1: i32) -> (i32, i32, i32) {
    %c0_i32 = arith.constant 0 : i32
    %c0_i32_0 = arith.constant 0 : i32
    %c0_i32_1 = arith.constant 0 : i32
    return %arg1, %c0_i32, %c0_i32_0 : i32, i32, i32
  }
  func.func @transform_9(%arg0: i32, %arg1: i32) -> (i32, i32, i32) {
    %c0_i32 = arith.constant 0 : i32
    %c0_i32_0 = arith.constant 0 : i32
    %c0_i32_1 = arith.constant 0 : i32
    return %arg1, %c0_i32, %c0_i32_0 : i32, i32, i32
  }
  func.func @transform_10(%arg0: i32, %arg1: i32) -> (i32, i32, i32) {
    %c0_i32 = arith.constant 0 : i32
    %c0_i32_0 = arith.constant 0 : i32
    %c0_i32_1 = arith.constant 0 : i32
    return %arg1, %c0_i32, %c0_i32_0 : i32, i32, i32
  }
  func.func @transform_11(%arg0: i32, %arg1: i32) -> (i32, i32, i32) {
    %c0_i32 = arith.constant 0 : i32
    %c0_i32_0 = arith.constant 0 : i32
    %c0_i32_1 = arith.constant 0 : i32
    return %arg1, %c0_i32, %c0_i32_0 : i32, i32, i32
  }
  func.func @transform_12(%arg0: i32, %arg1: i32) -> (i32, i32, i32) {
    %c0_i32 = arith.constant 0 : i32
    %c0_i32_0 = arith.constant 0 : i32
    %c0_i32_1 = arith.constant 0 : i32
    return %arg1, %c0_i32, %c0_i32_0 : i32, i32, i32
  }
  func.func @transform_13(%arg0: i32, %arg1: i32) -> (i32, i32, i32) {
    %c0_i32 = arith.constant 0 : i32
    %c0_i32_0 = arith.constant 0 : i32
    %c0_i32_1 = arith.constant 0 : i32
    return %arg1, %c0_i32, %c0_i32_0 : i32, i32, i32
  }
  func.func @transform_14(%arg0: i32, %arg1: i32) -> (i32, i32, i32) {
    %c0_i32 = arith.constant 0 : i32
    %c0_i32_0 = arith.constant 0 : i32
    %c0_i32_1 = arith.constant 0 : i32
    return %arg0, %c0_i32, %c0_i32_0 : i32, i32, i32
  }
}

</mosaic_0001>

<bundles_post_ra>
// kernel: tpu_custom_call.1
= control target key start
LH: loop header
LB: loop body
LE: loop exit
PB: predicated region body
PF: predicated region fallthrough
CT: control target
= control target key end

     0   :  { %s3696_s0 = inlined_call_operand.vmem [shape: f32[2,8,32], index: 0, kind: input, shape index: {}]   ;;  %s3697_s1 = inlined_call_operand.vmem [shape: f32[2,1,8], index: 1, kind: input, shape index: {}]   ;;  %s3698_s2 = inlined_call_operand.vmem [shape: bf16[2,32,96], index: 2, kind: input, shape index: {}]   ;;  %s3699_s3 = inlined_call_operand.vmem [shape: f32[2,1,96], index: 3, kind: input, shape index: {}]   ;;  %s3700_s4 = inlined_call_operand.vmem [shape: bf16[2,32,32], index: 4, kind: input, shape index: {}]   ;;  %s3701_s5 = inlined_call_operand.vmem [shape: f32[2,1,32], index: 5, kind: input, shape index: {}]   ;;  %s3702_s6 = inlined_call_operand.vmem [shape: f32[2,1,32], index: 6, kind: input, shape index: {}]   ;;  %s3703_s7 = inlined_call_operand.vmem [shape: f32[2,1,32], index: 7, kind: input, shape index: {}]   ;;  %s3704_s8 = inlined_call_operand.vmem [shape: bf16[2,32,1024], index: 8, kind: input, shape index: {}]   ;;  %s3705_s9 = inlined_call_operand.vmem [shape: f32[2,1,1024], index: 9, kind: input, shape index: {}]   ;;  %s3706_s10 = inlined_call_operand.vmem [shape: bf16[2,1024,32], index: 10, kind: input, shape index: {}]   ;;  %s3707_s11 = inlined_call_operand.vmem [shape: f32[2,1,32], index: 11, kind: input, shape index: {}]   ;;  %s3708_s12 = inlined_call_operand.vmem [shape: f32[2,1,32], index: 12, kind: input, shape index: {}]   ;;  %s3709_s13 = inlined_call_operand.vmem [shape: f32[2,1,32], index: 13, kind: input, shape index: {}]   ;;  %s3710_s14 = inlined_call_operand.hbm [shape: f32[2,8,32], index: 14, kind: output, shape index: {}]  }
   0x1   :  { %3726 = sst [smem:[#allocation19_spill]] %s3696_s0 }
   0x2   :  { %3727 = sst [smem:[#allocation20_spill]] %s3697_s1 }
   0x3   :  { %3728 = sst [smem:[#allocation21_spill]] %s3698_s2 }
   0x4   :  { %3729 = sst [smem:[#allocation22_spill]] %s3700_s4 }
   0x5   :  { %3730 = sst [smem:[#allocation23_spill]] %s3703_s7 }
   0x6   :  { %3731 = sst [smem:[#allocation24_spill]] %s3704_s8 }
   0x7   :  { %3732 = sst [smem:[#allocation25_spill]] %s3708_s12 }
   0x8   :  { %3733 = sst [smem:[#allocation26_spill]] %s3709_s13 }
   0x9   :  { %3734 = sst [smem:[#allocation27_spill]] %s3710_s14 }
   0xa   :  { %19 = vsyncpa [#allocation4], 0 }
   0xb   :  { %21 = vsyncpa [#allocation4 + $0x1], 0  ;;  %s3249_s29 = smov 0   ;;  %s3251_s30 = smov 0  }
   0xc   :  { %s3253_s15 = smov 0   ;;  %s3255_s16 = smov 0  }
   0xd   :  { %s3257_s17 = smov 0   ;;  %s3259_s18 = smov 0  }
   0xe   :  { %s3261_s19 = smov 0   ;;  %s3263_s20 = smov 0  }
   0xf LB: > { %3735 = sst [smem:[#allocation6_spill]] %s3126_s29  ;;  %s2578_s21 = sadd.s32 4294967295, %s3154_s20   ;;  %s3154_s20 = sphi %s3263_s20, %s27_s20   ;;  %s3150_s19 = sphi %s3261_s19, %s3783_s19   ;;  %s3146_s18 = sphi %s3259_s18, %s3782_s18   ;;  %s3142_s17 = sphi %s3257_s17, %s3781_s17   ;;  %s3138_s16 = sphi %s3255_s16, %s3780_s16   ;;  %s3134_s15 = sphi %s3253_s15, %s3779_s15   ;;  %s3130_s30 = sphi %s3251_s30, %s3778_s30   ;;  %s3126_s29 = sphi %s3249_s29, %s3777_s29  }
  0x10   : > { %3736 = sst [smem:[#allocation7_spill]] %s3130_s30  ;;  %s2579_s22 = sadd.s32 4294967294, %s3154_s20  }
  0x11   : > { %3737 = sst [smem:[#allocation8_spill]] %s3134_s15  ;;  %s36_s23 = sadd.s32 1, %s3146_s18 }
  0x12   : > { %3738 = sst [smem:[#allocation9_spill]] %s3138_s16  ;;  %p37_p0 = scmp.ge.s32.totalorder %s36_s23, 2 }
  0x13   : > { %3739 = sst [smem:[#allocation10_spill]] %s3142_s17  ;;  %s39_s24 = sadd.s32 1, %s3150_s19 }
  0x14   : > { %3740 = sst [smem:[#allocation11_spill]] %s3146_s18  ;;  %p420_p1 = scmp.ne.s32.totalorder %s3134_s15, %s3130_s30 }
  0x15   : > { %3741 = sst [smem:[#allocation12_spill]] %s3150_s19  ;;  %p421_p2 = scmp.eq.s32.totalorder %s2578_s21, 3 }
  0x16   : > { %3742 = sst [smem:[#allocation13_spill]] %s3154_s20  ;;  %s3785_s23 = smov (%p37_p0, %s36_s23), 0 }
  0x17   : > { %3743 = sst [smem:[#allocation14_spill]] %s3785_s23  ;;  %s3787_s24 = smov (!%p37_p0, %s39_s24), %s3150_s19 }
  0x18   : > { %p3298_p3 = por %p421_p2, %p420_p1  ;;  %p426_p4 = scmp.ne.s32.totalorder %s3130_s30, %s3126_s29 }
  0x19   : > { %p41_p5 = scmp.ge.s32.totalorder %s3787_s24, 2  ;;  %p427_p6 = scmp.eq.s32.totalorder %s2579_s22, 3 }
  0x1a   : > { %s3744_s25 = scalar_select %p3298_p3, 1, 0 }
  0x1b   : > { %p2582_p7 = scmp.ge.s32.totalorder %s3154_s20, 1  ;;  %p539_p8 = scmp.lt.s32.totalorder %s3154_s20, 5 }
  0x1c   : > { %3745 = sst [smem:[#allocation15_spill]] %s3744_s25  ;;  %s3789_s24 = smov (%p41_p5, %s3787_s24), 0 }
  0x1d   : > { %3746 = sst [smem:[#allocation16_spill]] %s3789_s24  ;;  %p3308_p9 = por %p427_p6, %p426_p4 }
  0x1e   : > { %p540_p10 = pnand %p2582_p7, %p539_p8  ;;  %s407_s27 = ssub.s32 %s3150_s19, %s3789_s24 }
  0x1f   : > { %s3747_s26 = scalar_select %p3308_p9, 1, 0 }
  0x20   : > { %s410_s28 = sadd.s32 1, %s3134_s15  ;;  %p408_p11 = scmp.eq.s32.totalorder %s407_s27, 0 }
  0x21   : > { %3748 = sst [smem:[#allocation17_spill]] %s3747_s26  ;;  %543 = sbr.rel (%p540_p10) target bundleno = 2678 (0xa76), region = 76 }
  0x22   : > { %s3316_s21 = scalar_select %p408_p11, %s3134_s15, %s410_s28  }
  0x23   : > { %s3713_s22 = sand.u32 (!%p540_p10), 1, %s3130_s30   ;;  %p632_p12 = scmp.lt.s32.totalorder (!%p540_p10), %s3142_s17, 1 }
  0x24   : > { %3749 = sst [smem:[#allocation18_spill]] %s3316_s21  ;;  %s3322_s23 = sshll.u32 (!%p540_p10), %s3713_s22, 3 }
  0x25   : > { %p639_p13 = scmp.lt.s32.totalorder (!%p540_p10), %s3138_s16, 1  ;;  %s3751_s0 = sld [smem:[#allocation19_spill]] (!%p540_p10) }
  0x26   : > { %s3752_s2 = sld [smem:[#allocation21_spill]] (!%p540_p10)  ;;  %s3753_s4 = sld [smem:[#allocation22_spill]] (!%p540_p10) }
  0x27   : > { %s3755_s8 = sld [smem:[#allocation24_spill]] (!%p540_p10)  ;;  %s3757_s7 = sld [smem:[#allocation26_spill]] (!%p540_p10) }
  0x28   : > { %s3326_s18 = scalar_select %p632_p12, %s3142_s17, 1 }
  0x29   : > { %s3329_s27 = scalar_select %p639_p13, %s3138_s16, 1 }
  0x2a   : > { %s2584_s28 = sshll.u32 %s3326_s18, 3  ;;  %s3756_s16 = sld [smem:[#allocation25_spill]] }
  0x2b   : > { %s635_s26 = scalar_lea.vmem %s3751_s0, %s2584_s28  ;;  %s2706_s29 = sshll.u32 %s3329_s27, 4 }
  0x2c   : > { %s643_s25 = scalar_lea.vmem %s3752_s2, %s2706_s29  ;;  %s3350_s24 = scalar_lea.vmem %s3753_s4, %s2706_s29 }
  0x2d   : > { %s2708_s1 = sshll.u32 %s3329_s27, 7  ;;  %s2591_s30 = sshll.u32 %s3329_s27, 3 }
  0x2e   : > { %s3369_s12 = scalar_lea.vmem %s3755_s8, %s2708_s1  ;;  %s3374_s22 = scalar_lea.vmem %s3705_s9, %s2591_s30 }
  0x2f   : > { %s2709_s15 = sshll.u32 %s3329_s27, 9  ;;  %s677_s28 = scalar_lea.vmem %s3707_s11, %s3329_s27 }
  0x30   : > { %s3384_s20 = scalar_lea.vmem %s3706_s10, %s2709_s15  ;;  %s680_s1 = scalar_lea.vmem %s3756_s16, %s3329_s27 }
  0x31   : > { %s683_s13 = scalar_lea.vmem %s3757_s7, %s3329_s27  ;;  %s631_s30 = scalar_lea.vmem [#allocation3], %s3322_s23 }
  0x32   : > { %s3758_s29 = sld [smem:[#allocation9_spill]] }
  0x38   : > { %p2594_p0 = scmp.ne.s32.totalorder %s3758_s29, 0 }
  0x39   : > { %v689_v0 = vld [vmem:[%s635_s26] sm:$0xff] (!%p2594_p0)  ;;  %vm690_vm0 = vcmask (!%p2594_p0), 261120  }
  0x3a   : > { %688 = sbr.rel (%p2594_p0) target bundleno = 65 (0x41), region = 80  ;;  %691 = vst.msk [vmem:[#allocation2] sm:$0xff] (!%p2594_p0), %vm690_vm0, %v689_v0 }
  0x41 PF: > { %v2972_v1 = vld [vmem:[%s643_s25] sm:$0xff]   ;;  %v3156_v2 = vmov 0.0   ;;  %v2973_v3 = vld [vmem:[%s643_s25 + $0x8] sm:$0xff]   ;;  %vm3157_vm1 = vmmov 0   ;;  %vm717_vm2 = vcmask 261120   ;;  %s3759_s4 = scalar_lea.vmem %s3699_s3, %s3329_s27  ;;  %s3158_s7 = smov 120  }
  0x42   : > { %2820 = vmatprep.subr.bf16.mxu0 %v3156_v2  ;;  %2828 = vmatprep.subr.bf16.mxu1 %v3156_v2  ;;  %v3400_v4 = vld [vmem:[#allocation2] sm:$0xff]  ;;  %s3159_s8 = smov 96   ;;  %s3160_s25 = smov 80   ;;  %vm772_vm3 = vcmask 64512   ;;  %vm836_vm4 = vcmask 1043456   ;;  %vm1223_vm5 = vcmask 130048  }
  0x43   : > { %2821 = vmatpush3.bf16.msra.mxu0 %v2972_v1  ;;  %2824 = vmatprep.mubr.msk.bf16.mxu0 %vm3157_vm1, %v3156_v2  ;;  %v693_v5 = vpack.c.bf16 %v3400_v4, %v3400_v4  ;;  %v2595_v6 = vld [vmem:[%s3759_s4] ss:$0 sm:$0xff]  ;;  %s3161_s26 = smov 88   ;;  %s3162_s21 = smov 72   ;;  %vm1225_vm6 = vcmask 195584  }
  0x44   : > { %2822 = vmatprep.subr.bf16.mxu0 %v3156_v2  ;;  %2830 = vmatprep.mubr.msk.bf16.mxu1 %vm3157_vm1, %v3156_v2  ;;  %s3163_s15 = smov 112   ;;  %s3164_s19 = smov 104  }
  0x45   : > { %s3760_s17 = sld [smem:[#allocation20_spill]]  ;;  %s3166_s0 = smov 64  }
  0x46   : > { %s3167_s2 = smov 40   ;;  %s3168_s4 = smov 48  }
  0x47   : > { %2823 = vmatpush3.bf16.msra.mxu0 %v2973_v3  ;;  %s3763_s14 = scalar_lea.vmem %s3702_s6, %s3329_s27 }
  0x48   : > { %2834 = vmatprep.subr.bf16.mxu0 %v3156_v2 }
  0x4a   : > { %2825 = vmatmul.mubr.msk.bf16.vlgmr.msra.gmra.mrb[0].mxu0 %vm717_vm2, %v693_v5 }
  0x4b   : > { %2836 = vmatprep.mubr.msk.bf16.mxu0 %vm3157_vm1, %v3156_v2  ;;  %s3761_s29 = scalar_lea.vmem %s3760_s17, %s3326_s18  ;;  %s3165_s18 = smov 56  }
  0x4c   : > { %v2599_v24 = vld [vmem:[%s3761_s29] ss:$0 sm:$0xff]  ;;  %s3764_s29 = sld [smem:[#allocation23_spill]] }
 0x11d   : > { %v755_v7 = vpop.f32.mrb[0].mxu0 }
 0x11e   : > { %v756_v8 = vadd.f32 %v2595_v6, %v755_v7  ;;  %v2826_v9 = vpop.f32.mrb[1].mxu0 }
 0x11f   : > { %v758_v10 = vpop.f32.mrb[2].mxu0 }
 0x120   : > { %v3416_v11 = vpack.c.bf16 %v756_v8, %v756_v8  ;;  %v2827_v12 = vpop.f32.mrb[3].mxu0 }
 0x122   : > { %880 = vrot.lane.b32.xlu1 %v3416_v11, %s3158_s7  ;;  %770 = vrot.lane.b32.xlu0 %v3416_v11, %s3159_s8  ;;  %s3169_s7 = smov 8   ;;  %s3170_s8 = smov 16  }
 0x126   : > { %992 = vrot.lane.b32.xlu1 %v3416_v11, %s3160_s25  ;;  %882 = vrot.lane.b32.xlu0 %v3416_v11, %s3161_s26  ;;  %s3171_s25 = smov 24  }
 0x12a   : > { %1102 = vrot.lane.b32.xlu1 %v3416_v11, %s3162_s21  ;;  %990 = vrot.lane.b32.xlu0 %v3416_v11, %s3163_s15  ;;  %s3762_s21 = scalar_lea.vmem %s3701_s5, %s3329_s27 }
 0x12e   : > { %1100 = vrot.lane.b32.xlu0 %v3416_v11, %s3164_s19 }
 0x194   : > { %v771_v13 = vpop.permute.xlu0 %770  ;;  %v881_v16 = vpop.permute.xlu1 %880 }
 0x195   : > { %v777_v14 = vsel %vm772_vm3, %v771_v13, 0 }
 0x196   : > { %2829 = vmatpush3.bf16.xpose.msra.mxu1 %v777_v14 }
 0x197   : > { %2840 = vmatprep.subr.bf16.mxu1 %v3156_v2 }
 0x198   : > { %v883_v15 = vpop.permute.xlu0 %882  ;;  %v993_v18 = vpop.permute.xlu1 %992 }
 0x199   : > { %v888_v17 = vsel %vm772_vm3, %v883_v15, 0  ;;  %v998_v19 = vsel %vm772_vm3, %v993_v18, 0 }
 0x19c   : > { %v1103_v20 = vpop.permute.xlu1 %1102  ;;  %v991_v21 = vpop.permute.xlu0 %990 }
 0x19d   : > { %2831 = vmatmul.mubr.msk.bf16.vlgmr.msra.gmra.mrb[0].mxu1 %vm772_vm3, %v3416_v11  ;;  %v1108_v22 = vsel %vm772_vm3, %v1103_v20, 0 }
 0x19e   : > { %2841 = vmatpush3.bf16.xpose.msra.mxu1 %v888_v17  ;;  %2842 = vmatprep.mubr.msk.bf16.mxu1 %vm3157_vm1, %v3156_v2 }
 0x19f   : > { %2852 = vmatprep.subr.bf16.mxu1 %v3156_v2 }
 0x1a0   : > { %v1101_v23 = vpop.permute.xlu0 %1100 }
 0x1a5   : > { %2843 = vmatmul.mubr.msk.bf16.vlgmr.msra.gmra.mrb[4].mxu1 %vm772_vm3, %v881_v16 }
 0x1a6   : > { %2853 = vmatpush3.bf16.xpose.msra.mxu1 %v998_v19  ;;  %2854 = vmatprep.mubr.msk.bf16.mxu1 %vm3157_vm1, %v3156_v2 }
 0x1a7   : > { %2864 = vmatprep.subr.bf16.mxu1 %v3156_v2 }
 0x1ad   : > { %2855 = vmatmul.mubr.msk.bf16.vlgmr.msra.gmra.mrb[8].mxu1 %vm772_vm3, %v991_v21 }
 0x1ae   : > { %2865 = vmatpush3.bf16.xpose.msra.mxu1 %v1108_v22  ;;  %2866 = vmatprep.mubr.msk.bf16.mxu1 %vm3157_vm1, %v3156_v2 }
 0x1af   : > { %2876 = vmatprep.subr.bf16.mxu1 %v3156_v2 }
 0x1b5   : > { %2867 = vmatmul.mubr.msk.bf16.vlgmr.msra.gmra.mrb[12].mxu1 %vm772_vm3, %v1101_v23 }
 0x1b6   : > { %2880 = vmatprep.mubr.msk.bf16.mxu1 %vm3157_vm1, %v3156_v2 }
 0x270   : > { %v813_v25 = vpop.f32.mrb[0].mxu1 }
 0x271   : > { %v814_v26 = vadd.f32 %v2599_v24, %v813_v25  ;;  %v2832_v27 = vpop.f32.mrb[1].mxu1 }
 0x272   : > { %v816_v28 = vpop.f32.mrb[2].mxu1 }
 0x273   : > { %v2833_v29 = vpop.f32.mrb[3].mxu1  ;;  %v819_v30 = vsel %vm772_vm3, %v814_v26, -inf }
 0x274   : > { %820 = vmax.xlane.f32.xlu1 %v819_v30 }
 0x278   : > { %v924_v31 = vpop.f32.mrb[4].mxu1 }
 0x279   : > { %v925_v32 = vadd.f32 %v2599_v24, %v924_v31  ;;  %v2844_v33 = vpop.f32.mrb[5].mxu1 }
 0x27a   : > { %v927_v34 = vpop.f32.mrb[6].mxu1 }
 0x27b   : > { %v2845_v35 = vpop.f32.mrb[7].mxu1  ;;  %v930_v36 = vsel %vm772_vm3, %v925_v32, -inf }
 0x27c   : > { %931 = vmax.xlane.f32.xlu0 %v930_v36 }
 0x280   : > { %v1034_v37 = vpop.f32.mrb[8].mxu1 }
 0x281   : > { %v1035_v38 = vadd.f32 %v2599_v24, %v1034_v37  ;;  %v2856_v39 = vpop.f32.mrb[9].mxu1 }
 0x282   : > { %v1037_v40 = vpop.f32.mrb[10].mxu1  ;;  %v2974_v39 = vld [vmem:[%s3350_s24] sm:$0xff]  }
 0x283   : > { %v2857_v41 = vpop.f32.mrb[11].mxu1  ;;  %v1040_v42 = vsel %vm772_vm3, %v1035_v38, -inf  ;;  %2877 = vmatpush3.bf16.msra.mxu1 %v2974_v39  ;;  %v2975_v40 = vld [vmem:[%s3350_s24 + $0x8] sm:$0xff]   ;;  %v1340_v39 = vld [vmem:[%s3369_s12 + $0x70] sm:$0xff] }
 0x284   : > { %1041 = vmax.xlane.f32.xlu0 %v1040_v42  ;;  %2878 = vmatprep.subr.bf16.mxu1 %v3156_v2 }
 0x287   : > { %2879 = vmatpush3.bf16.msra.mxu1 %v2975_v40  ;;  %v1337_v40 = vld [vmem:[%s3369_s12 + $0x58] sm:$0xff] }
 0x288   : > { %v1144_v43 = vpop.f32.mrb[12].mxu1 }
 0x289   : > { %v1145_v44 = vadd.f32 %v2599_v24, %v1144_v43  ;;  %v2868_v45 = vpop.f32.mrb[13].mxu1 }
 0x28a   : > { %v1147_v46 = vpop.f32.mrb[14].mxu1 }
 0x28b   : > { %v2869_v47 = vpop.f32.mrb[15].mxu1  ;;  %v1150_v48 = vsel %vm772_vm3, %v1145_v44, -inf }
 0x28c   : > { %1151 = vmax.xlane.f32.xlu1 %v1150_v48 }
 0x301   : > { %v821_v49 = vpop.xlane.xlu1 %820 }
 0x302   : > { %v822_v50 = vsub.f32 %v814_v26, %v821_v49 }
 0x304   : > { %v823_v51 = vmul.f32 1.442695, %v822_v50 }
 0x306   : > { %3040 = vpow2.f32 %v823_v51 }
 0x309   : > { %v932_v52 = vpop.xlane.xlu0 %931 }
 0x30a   : > { %v933_v53 = vsub.f32 %v925_v32, %v932_v52 }
 0x30c   : > { %v934_v54 = vmul.f32 1.442695, %v933_v53 }
 0x30e   : > { %3042 = vpow2.f32 %v934_v54 }
 0x310   : > { %v3041_v55 = vpop.eup %3040 }
 0x311   : > { %v1042_v56 = vpop.xlane.xlu0 %1041  ;;  %v825_v57 = vsel %vm772_vm3, %v3041_v55, 0.0 }
 0x312   : > { %v1043_v58 = vsub.f32 %v1035_v38, %v1042_v56  ;;  %826 = vadd.xlane.f32.xlu0 %v825_v57 }
 0x314   : > { %v1044_v59 = vmul.f32 1.442695, %v1043_v58 }
 0x316   : > { %3044 = vpow2.f32 %v1044_v59 }
 0x318   : > { %v3043_v60 = vpop.eup %3042 }
 0x319   : > { %v936_v61 = vsel %vm772_vm3, %v3043_v60, 0.0  ;;  %v1152_v0 = vpop.xlane.xlu1 %1151 }
 0x31a   : > { %937 = vadd.xlane.f32.xlu1 %v936_v61  ;;  %v1153_v1 = vsub.f32 %v1145_v44, %v1152_v0 }
 0x31c   : > { %v1154_v3 = vmul.f32 1.442695, %v1153_v1 }
 0x31e   : > { %3046 = vpow2.f32 %v1154_v3 }
 0x320   : > { %v3045_v62 = vpop.eup %3044 }
 0x321   : > { %v1046_v63 = vsel %vm772_vm3, %v3045_v62, 0.0 }
 0x322   : > { %1047 = vadd.xlane.f32.xlu0 %v1046_v63 }
 0x328   : > { %v3047_v5 = vpop.eup %3046 }
 0x329   : > { %v1156_v6 = vsel %vm772_vm3, %v3047_v5, 0.0 }
 0x32b   : > { %942 = vrot.lane.b32.xlu1 %v3416_v11, %s3165_s18  ;;  %s3765_s18 = scalar_lea.vmem %s3764_s29, %s3329_s27 }
 0x338   : > { %831 = vrot.lane.b32.xlu0 %v3416_v11, %s3166_s0 }
 0x33c   : > { %1162 = vrot.lane.b32.xlu0 %v3416_v11, %s3167_s2 }
 0x34f   : > { %1157 = vadd.xlane.f32.xlu1 %v1156_v6  ;;  %v1326_v6 = vld [vmem:[%s3369_s12] sm:$0xff] }
 0x360   : > { %1052 = vrot.lane.b32.xlu1 %v3416_v11, %s3168_s4 }
 0x39f   : > { %v827_v7 = vpop.xlane.xlu0 %826 }
 0x3a0   : > { %3048 = vrcp.f32 %v827_v7  ;;  %v1330_v7 = vld [vmem:[%s3369_s12 + $0x20] sm:$0xff] }
 0x3a7   : > { %v938_v8 = vpop.xlane.xlu1 %937 }
 0x3a8   : > { %3050 = vrcp.f32 %v938_v8  ;;  %v1327_v8 = vld [vmem:[%s3369_s12 + $0x8] sm:$0xff] }
 0x3aa   : > { %v3049_v9 = vpop.eup %3048 }
 0x3ab   : > { %v829_v12 = vmul.f32 %v3049_v9, %v3041_v55  ;;  %v943_v15 = vpop.permute.xlu1 %942  ;;  %v2608_v55 = vld [vmem:[%s3762_s21] ss:$0 sm:$0xff]  ;;  %v2615_v9 = vcombine.high %v1326_v6, %v1330_v7 }
 0x3ac   : > { %v948_v18 = vsel %vm836_vm4, %v943_v15, 0  ;;  %v1338_v15 = vld [vmem:[%s3369_s12 + $0x60] sm:$0xff] }
 0x3ad   : > { %v830_v16 = vpack.c.bf16 %v829_v12, %v829_v12 }
 0x3af   : > { %v1048_v10 = vpop.xlane.xlu0 %1047 }
 0x3b0   : > { %3052 = vrcp.f32 %v1048_v10  ;;  %v1331_v10 = vld [vmem:[%s3369_s12 + $0x28] sm:$0xff] }
 0x3b1   : > { %v2616_v12 = vcombine.low %v1327_v8, %v1331_v10 }
 0x3b2   : > { %v3051_v17 = vpop.eup %3050 }
 0x3b3   : > { %v832_v13 = vpop.permute.xlu0 %831  ;;  %v940_v11 = vmul.f32 %v3051_v17, %v3043_v60 }
 0x3b4   : > { %v838_v14 = vsel %vm836_vm4, %v832_v13, 0  ;;  %v2617_v13 = vcombine.high %v1327_v8, %v1331_v10  ;;  %v2999_v8 = vld [vmem:[%s3384_s20 + $0xa8] sm:$0xff]   ;;  %v3001_v10 = vld [vmem:[%s3384_s20 + $0xf0] sm:$0xff]  }
 0x3b5   : > { %2835 = vmatpush3.bf16.msra.mxu0 %v838_v14  ;;  %v941_v19 = vpack.c.bf16 %v940_v11, %v940_v11  ;;  %v1334_v14 = vld [vmem:[%s3369_s12 + $0x40] sm:$0xff]  ;;  %v1339_v11 = vld [vmem:[%s3369_s12 + $0x68] sm:$0xff] }
 0x3b6   : > { %2846 = vmatprep.subr.bf16.mxu0 %v3156_v2  ;;  %1508 = vmatprep.subr.bf16.mxu1 %v2617_v13  ;;  %v2622_v17 = vcombine.low %v1334_v14, %v1338_v15  ;;  %v3004_v13 = vld [vmem:[%s3384_s20 + $0x78] sm:$0xff]  }
 0x3b7   : > { %v1163_v25 = vpop.permute.xlu0 %1162 }
 0x3b8   : > { %2837 = vmatmul.mubr.msk.bf16.vlgmr.msra.gmra.mrb[4].mxu0 %vm772_vm3, %v830_v16  ;;  %v1168_v27 = vsel %vm836_vm4, %v1163_v25, 0  ;;  %v1335_v16 = vld [vmem:[%s3369_s12 + $0x48] sm:$0xff] }
 0x3b9   : > { %2847 = vmatpush3.bf16.msra.mxu0 %v948_v18  ;;  %2848 = vmatprep.mubr.msk.bf16.mxu0 %vm3157_vm1, %v3156_v2  ;;  %v2623_v18 = vcombine.high %v1334_v14, %v1338_v15  ;;  %v3005_v14 = vld [vmem:[%s3384_s20 + $0xf8] sm:$0xff]  }
 0x3ba   : > { %2858 = vmatprep.subr.bf16.mxu0 %v3156_v2  ;;  %v3053_v20 = vpop.eup %3052  ;;  %v3006_v15 = vld [vmem:[%s3384_s20 + $0x38] sm:$0xff]  }
 0x3bb   : > { %v1050_v22 = vmul.f32 %v3053_v20, %v3045_v62  ;;  %v2625_v20 = vcombine.high %v1335_v16, %v1339_v11 }
 0x3bd   : > { %v1051_v26 = vpack.c.bf16 %v1050_v22, %v1050_v22  ;;  %v1328_v22 = vld [vmem:[%s3369_s12 + $0x10] sm:$0xff] }
 0x3c0   : > { %2849 = vmatmul.mubr.msk.bf16.vlgmr.msra.gmra.mrb[8].mxu0 %vm772_vm3, %v941_v19  ;;  %v2624_v19 = vcombine.low %v1335_v16, %v1339_v11  ;;  %v3007_v16 = vld [vmem:[%s3384_s20 + $0xb8] sm:$0xff]   ;;  %v1344_v11 = vlaneseq }
 0x3c1   : > { %2860 = vmatprep.mubr.msk.bf16.mxu0 %vm3157_vm1, %v3156_v2 }
 0x3dc   : > { %v1158_v21 = vpop.xlane.xlu1 %1157 }
 0x3dd   : > { %3054 = vrcp.f32 %v1158_v21  ;;  %v3172_v21 = vmov 0  }
 0x3e0   : > { %v1053_v23 = vpop.permute.xlu1 %1052 }
 0x3e1   : > { %v1058_v24 = vsel %vm836_vm4, %v1053_v23, 0  ;;  %v1332_v23 = vld [vmem:[%s3369_s12 + $0x30] sm:$0xff] }
 0x3e2   : > { %2859 = vmatpush3.bf16.msra.mxu0 %v1058_v24  ;;  %v1329_v24 = vld [vmem:[%s3369_s12 + $0x18] sm:$0xff]  ;;  %v2619_v25 = vcombine.high %v1328_v22, %v1332_v23 }
 0x3e3   : > { %2870 = vmatprep.subr.bf16.mxu0 %v3156_v2 }
 0x3e5   : > { %2861 = vmatmul.mubr.msk.bf16.vlgmr.msra.gmra.mrb[12].mxu0 %vm772_vm3, %v1051_v26  ;;  %v1333_v26 = vld [vmem:[%s3369_s12 + $0x38] sm:$0xff] }
 0x3e6   : > { %2871 = vmatpush3.bf16.msra.mxu0 %v1168_v27  ;;  %2872 = vmatprep.mubr.msk.bf16.mxu0 %vm3157_vm1, %v3156_v2  ;;  %v2618_v27 = vcombine.low %v1328_v22, %v1332_v23  ;;  %v3566_v22 = vld [vmem:[%s3374_s22] sm:$0xff] }
 0x3e7   : > { %v3055_v28 = vpop.eup %3054  ;;  %1467 = vmatprep.subr.bf16.mxu0 %v2615_v9  ;;  %v3000_v9 = vld [vmem:[%s3384_s20 + $0x70] sm:$0xff]  }
 0x3e8   : > { %v1160_v29 = vmul.f32 %v3055_v28, %v3047_v5  ;;  %v2620_v28 = vcombine.low %v1329_v24, %v1333_v26 }
 0x3ea   : > { %v1161_v30 = vpack.c.bf16 %v1160_v29, %v1160_v29  ;;  %v2621_v29 = vcombine.high %v1329_v24, %v1333_v26 }
 0x3ed   : > { %2873 = vmatmul.mubr.msk.bf16.vlgmr.msra.gmra.mrb[16].mxu0 %vm772_vm3, %v1161_v30 }
 0x3ee   : > { %1499 = vmatprep.mubr.bf16.mxu0 %v3172_v21 }
 0x48b   : > { %v874_v31 = vpop.f32.mrb[4].mxu0 }
 0x48c   : > { %v2838_v32 = vpop.f32.mrb[5].mxu0 }
 0x48d   : > { %v877_v33 = vpop.f32.mrb[6].mxu0 }
 0x48e   : > { %v2839_v34 = vpop.f32.mrb[7].mxu0 }
 0x48f   : > { %v2612_v34 = vld [vmem:[%s3763_s14] ss:$0 sm:$0xff] }
 0x493   : > { %v984_v35 = vpop.f32.mrb[8].mxu0 }
 0x494   : > { %1211 = vrot.lane.b32.xlu1 %v984_v35, %s3169_s7  ;;  %v2850_v36 = vpop.f32.mrb[9].mxu0 }
 0x495   : > { %v987_v37 = vpop.f32.mrb[10].mxu0  ;;  %v2613_v36 = vld [vmem:[%s3765_s18] ss:$0 sm:$0xff] }
 0x496   : > { %v2851_v38 = vpop.f32.mrb[11].mxu0 }
 0x497   : > { %v1336_v38 = vld [vmem:[%s3369_s12 + $0x50] sm:$0xff] }
 0x4b8   : > { %v1094_v41 = vpop.f32.mrb[12].mxu0 }
 0x4b9   : > { %1215 = vrot.lane.b32.xlu0 %v1094_v41, %s3170_s8  ;;  %v2862_v42 = vpop.f32.mrb[13].mxu0  ;;  %v1341_v41 = vld [vmem:[%s3369_s12 + $0x78] sm:$0xff]  ;;  %s3768_s8 = sld [smem:[#allocation9_spill]] }
 0x4ba   : > { %v1097_v43 = vpop.f32.mrb[14].mxu0 }
 0x4bb   : > { %v2863_v44 = vpop.f32.mrb[15].mxu0 }
 0x4bc   : > { %v2627_v44 = vcombine.high %v1336_v38, %v1340_v39 }
 0x4bf   : > { %p2701_p1 = scmp.ne.s32.totalorder %s3768_s8, 1 }
 0x4c0   : > { %v1204_v45 = vpop.f32.mrb[16].mxu0 }
 0x4c1   : > { %1219 = vrot.lane.b32.xlu1 %v1204_v45, %s3171_s25  ;;  %v2874_v46 = vpop.f32.mrb[17].mxu0  ;;  %v2629_v45 = vcombine.high %v1337_v40, %v1341_v41 }
 0x4c2   : > { %v1207_v47 = vpop.f32.mrb[18].mxu0  ;;  %v2626_v46 = vcombine.low %v1336_v38, %v1340_v39 }
 0x4c3   : > { %v2875_v48 = vpop.f32.mrb[19].mxu0  ;;  %v2628_v47 = vcombine.low %v1337_v40, %v1341_v41 }
 0x4c4   : > { %v2976_v48 = vld [vmem:[%s3384_s20 + $0x40] sm:$0xff]  }
 0x506   : > { %v1212_v49 = vpop.permute.xlu1 %1211 }
 0x507   : > { %v1222_v2 = vsel %vm772_vm3, %v874_v31, %v1212_v49  ;;  %v2977_v49 = vld [vmem:[%s3384_s20 + $0xc0] sm:$0xff]  }
 0x52b   : > { %v1216_v50 = vpop.permute.xlu0 %1215 }
 0x52c   : > { %v1224_v51 = vsel %vm1223_vm5, %v1222_v2, %v1216_v50  ;;  %v2978_v50 = vld [vmem:[%s3384_s20] sm:$0xff]  }
 0x52d   : > { %v2979_v2 = vld [vmem:[%s3384_s20 + $0x80] sm:$0xff]  }
 0x533   : > { %v1220_v52 = vpop.permute.xlu1 %1219 }
 0x534   : > { %v1226_v53 = vsel %vm1225_vm6, %v1224_v51, %v1220_v52  ;;  %v2980_v51 = vld [vmem:[%s3384_s20 + $0x48] sm:$0xff]  }
 0x535   : > { %v1227_v54 = vpack.c.bf16 %v1226_v53, %v1226_v53  ;;  %v2981_v52 = vld [vmem:[%s3384_s20 + $0xc8] sm:$0xff]  }
 0x536   : > { %v2982_v53 = vld [vmem:[%s3384_s20 + $0x8] sm:$0xff]  }
 0x537   : > { %2881 = vmatmul.mubr.msk.bf16.vlgmr.msra.gmra.mrb[16].mxu1 %vm717_vm2, %v1227_v54  ;;  %v2983_v54 = vld [vmem:[%s3384_s20 + $0x88] sm:$0xff]  }
 0x538   : > { %1509 = vmatpush1.bf16.msra.mxu1 %v2616_v12  ;;  %1540 = vmatprep.mubr.bf16.mxu1 %v3172_v21  ;;  %v3003_v12 = vld [vmem:[%s3384_s20 + $0xb0] sm:$0xff]  }
 0x539   : > { %1510 = vmatprep.subr.bf16.mxu1 %v2625_v20 }
 0x53c   : > { %1511 = vmatpush1.bf16.msra.mxu1 %v2624_v19  ;;  %v3561_v19 = vshrl.u32 %v1344_v11, 7  ;;  %v3024_v11 = vld [vmem:[%s3384_s20 + $0x160] sm:$0xff]  }
 0x53d   : > { %1590 = vmatprep.subr.bf16.mxu1 %v2621_v29 }
 0x53e   : > { %v1346_v20 = vsub.s32 0, %v3561_v19  ;;  %v1350_v23 = vsub.s32 1, %v3561_v19  ;;  %v1358_v24 = vsub.s32 3, %v3561_v19  ;;  %v1366_v39 = vsub.s32 5, %v3561_v19 }
 0x53f   : > { %v1374_v40 = vsub.s32 7, %v3561_v19 }
 0x60a   : > { %v1288_v56 = vpop.f32.mrb[16].mxu1 }
 0x60b   : > { %v1289_v57 = vadd.f32 %v2608_v55, %v1288_v56  ;;  %v2882_v58 = vpop.f32.mrb[17].mxu1  ;;  %v2984_v55 = vld [vmem:[%s3384_s20 + $0x50] sm:$0xff]  }
 0x60c   : > { %v1291_v59 = vpop.f32.mrb[18].mxu1  ;;  %v2985_v56 = vld [vmem:[%s3384_s20 + $0xd0] sm:$0xff]  }
 0x60d   : > { %v2883_v60 = vpop.f32.mrb[19].mxu1  ;;  %v1294_v61 = vadd.f32 %v1289_v57, %v3400_v4  ;;  %v2614_v4 = vcombine.low %v1326_v6, %v1330_v7  ;;  %v2986_v57 = vld [vmem:[%s3384_s20 + $0x10] sm:$0xff]   ;;  %v2988_v59 = vld [vmem:[%s3384_s20 + $0x58] sm:$0xff]   ;;  %v2997_v6 = vld [vmem:[%s3384_s20 + $0xe8] sm:$0xff]  }
 0x60e   : > { %v2987_v58 = vld [vmem:[%s3384_s20 + $0x90] sm:$0xff]   ;;  %v2989_v60 = vld [vmem:[%s3384_s20 + $0xd8] sm:$0xff]   ;;  %v2998_v7 = vld [vmem:[%s3384_s20 + $0x28] sm:$0xff]  }
 0x60f   : > { %v1297_v62 = vsel %vm717_vm2, %v1294_v61, 0.0  ;;  %1468 = vmatpush1.bf16.msra.mxu0 %v2614_v4  ;;  %v3002_v4 = vld [vmem:[%s3384_s20 + $0x30] sm:$0xff]  }
 0x610   : > { %1298 = vadd.xlane.f32.xlu0 %v1297_v62  ;;  %1469 = vmatprep.subr.bf16.mxu0 %v2623_v18  ;;  %v2991_v62 = vld [vmem:[%s3384_s20 + $0x98] sm:$0xff]   ;;  %v3009_v18 = vld [vmem:[%s3384_s20 + $0x1c0] sm:$0xff]  }
 0x613   : > { %1470 = vmatpush1.bf16.msra.mxu0 %v2622_v17  ;;  %v3008_v17 = vld [vmem:[%s3384_s20 + $0x140] sm:$0xff]  }
 0x614   : > { %1549 = vmatprep.subr.bf16.mxu0 %v2619_v25  ;;  %v1347_v25 = vrot.slane %v3566_v22, %v1346_v20  ;;  %v3025_v20 = vld [vmem:[%s3384_s20 + $0x1e0] sm:$0xff]  }
 0x69d   : > { %v1299_v63 = vpop.xlane.xlu0 %1298 }
 0x69e   : > { %v1301_v0 = vmul.f32 0.03125, %v1299_v63  ;;  %v2992_v63 = vld [vmem:[%s3384_s20 + $0x60] sm:$0xff]  }
 0x6a0   : > { %v1302_v1 = vsub.f32 %v1294_v61, %v1301_v0  ;;  %v2990_v61 = vld [vmem:[%s3384_s20 + $0x18] sm:$0xff]   ;;  %v2993_v0 = vld [vmem:[%s3384_s20 + $0xe0] sm:$0xff]  }
 0x6a2   : > { %v1303_v3 = vmul.f32 %v1302_v1, %v1302_v1 }
 0x6a4   : > { %v1304_v5 = vsel %vm717_vm2, %v1303_v3, 0.0  ;;  %v2995_v3 = vld [vmem:[%s3384_s20 + $0xa0] sm:$0xff]  }
 0x6a5   : > { %1305 = vadd.xlane.f32.xlu1 %v1304_v5  ;;  %v2996_v5 = vld [vmem:[%s3384_s20 + $0x68] sm:$0xff]  }
 0x732   : > { %v1306_v30 = vpop.xlane.xlu1 %1305 }
 0x733   : > { %v1307_v31 = vmul.f32 0.03125, %v1306_v30 }
 0x735   : > { %v1308_v32 = vadd.f32 1e-05, %v1307_v31 }
 0x737   : > { %3056 = vrsqrt.f32 %v1308_v32 }
 0x741   : > { %v3057_v33 = vpop.eup %3056 }
 0x742   : > { %v1310_v35 = vmul.f32 %v3057_v33, %v1302_v1  ;;  %v2994_v1 = vld [vmem:[%s3384_s20 + $0x20] sm:$0xff]  }
 0x744   : > { %v1317_v37 = vmul.f32 %v2612_v34, %v1310_v35 }
 0x746   : > { %v3519_v42 = vadd.f32 %v2613_v36, %v1317_v37 }
 0x748   : > { %v1325_v43 = vpack.c.bf16 %v3519_v42, %v3519_v42 }
 0x74a   : > { %2630 = vmatmul.mubr.msk.bf16.vlgmr.msra.gmra.mrb[20].mxu0 %vm717_vm2, %v1325_v43  ;;  %2631 = vmatmul.mubr.msk.bf16.vlgmr.msra.gmra.mrb[20].mxu1 %vm717_vm2, %v1325_v43 }
 0x74b   : > { %1550 = vmatpush1.bf16.msra.mxu0 %v2618_v27  ;;  %1591 = vmatpush1.bf16.msra.mxu1 %v2620_v28  ;;  %v1351_v27 = vrot.slane %v3566_v22, %v1350_v23  ;;  %v1359_v28 = vrot.slane %v3566_v22, %v1358_v24  ;;  %v3027_v23 = vld [vmem:[%s3384_s20 + $0x1a0] sm:$0xff]   ;;  %v1362_v24 = vsub.s32 4, %v3561_v19 }
 0x74c   : > { %1551 = vmatprep.subr.bf16.mxu0 %v2627_v44  ;;  %1592 = vmatprep.subr.bf16.mxu1 %v2629_v45 }
 0x74d   : > { %1581 = vmatprep.mubr.bf16.mxu0 %v3172_v21  ;;  %1622 = vmatprep.mubr.bf16.mxu1 %v3172_v21  ;;  %v1354_v21 = vsub.s32 2, %v3561_v19 }
 0x74f   : > { %1552 = vmatpush1.bf16.msra.mxu0 %v2626_v46  ;;  %1593 = vmatpush1.bf16.msra.mxu1 %v2628_v47  ;;  %v1355_v26 = vrot.slane %v3566_v22, %v1354_v21  ;;  %v3026_v21 = vld [vmem:[%s3384_s20 + $0x120] sm:$0xff]  }
 0x750   : > { %2732 = vmatprep.subr.bf16.mxu0 %v2976_v48  ;;  %2754 = vmatprep.subr.bf16.mxu1 %v2977_v49 }
 0x752   : > { %2632 = vmatmul.mubr.msk.bf16.vlgmr.msra.gmra.mrb[24].mxu0 %vm717_vm2, %v1325_v43  ;;  %2633 = vmatmul.mubr.msk.bf16.vlgmr.msra.gmra.mrb[24].mxu1 %vm717_vm2, %v1325_v43 }
 0x753   : > { %2733 = vmatpush3.bf16.msra.mxu0 %v2978_v50  ;;  %2755 = vmatpush3.bf16.msra.mxu1 %v2979_v2  ;;  %v1367_v50 = vrot.slane %v3566_v22, %v1366_v39  ;;  %v1375_v2 = vrot.slane %v3566_v22, %v1374_v40  ;;  %v3039_v39 = vld [vmem:[%s3384_s20 + $0x1b8] sm:$0xff]  }
 0x754   : > { %2734 = vmatprep.subr.bf16.mxu0 %v2980_v51  ;;  %2756 = vmatprep.subr.bf16.mxu1 %v2981_v52  ;;  %v3010_v51 = vld [vmem:[%s3384_s20 + $0x100] sm:$0xff]  }
 0x755   : > { %v3011_v52 = vld [vmem:[%s3384_s20 + $0x180] sm:$0xff]  }
 0x757   : > { %2735 = vmatpush3.bf16.msra.mxu0 %v2982_v53  ;;  %2757 = vmatpush3.bf16.msra.mxu1 %v2983_v54 }
 0x758   : > { %2736 = vmatprep.subr.bf16.mxu0 %v2984_v55  ;;  %2758 = vmatprep.subr.bf16.mxu1 %v2985_v56  ;;  %v3012_v55 = vld [vmem:[%s3384_s20 + $0x148] sm:$0xff]  }
 0x759   : > { %v3013_v56 = vld [vmem:[%s3384_s20 + $0x1c8] sm:$0xff]  }
 0x75b   : > { %2737 = vmatpush3.bf16.msra.mxu0 %v2986_v57  ;;  %2759 = vmatpush3.bf16.msra.mxu1 %v2987_v58 }
 0x75c   : > { %2738 = vmatprep.subr.bf16.mxu0 %v2988_v59  ;;  %2760 = vmatprep.subr.bf16.mxu1 %v2989_v60 }
 0x75f   : > { %2739 = vmatpush3.bf16.msra.mxu0 %v2990_v61  ;;  %2761 = vmatpush3.bf16.msra.mxu1 %v2991_v62 }
 0x760   : > { %2740 = vmatprep.subr.bf16.mxu0 %v2992_v63  ;;  %2762 = vmatprep.subr.bf16.mxu1 %v2993_v0 }
 0x763   : > { %2741 = vmatpush3.bf16.msra.mxu0 %v2994_v1  ;;  %2763 = vmatpush3.bf16.msra.mxu1 %v2995_v3  ;;  %v3014_v1 = vld [vmem:[%s3384_s20 + $0x108] sm:$0xff]  }
 0x764   : > { %2742 = vmatprep.subr.bf16.mxu0 %v2996_v5  ;;  %2764 = vmatprep.subr.bf16.mxu1 %v2997_v6  ;;  %v3015_v3 = vld [vmem:[%s3384_s20 + $0x188] sm:$0xff]  }
 0x767   : > { %2743 = vmatpush3.bf16.msra.mxu0 %v2998_v7  ;;  %2765 = vmatpush3.bf16.msra.mxu1 %v2999_v8  ;;  %v3016_v7 = vld [vmem:[%s3384_s20 + $0x150] sm:$0xff]  }
 0x768   : > { %2744 = vmatprep.subr.bf16.mxu0 %v3000_v9  ;;  %2766 = vmatprep.subr.bf16.mxu1 %v3001_v10  ;;  %v3017_v8 = vld [vmem:[%s3384_s20 + $0x1d0] sm:$0xff]  }
 0x76b   : > { %2745 = vmatpush3.bf16.msra.mxu0 %v3002_v4  ;;  %2767 = vmatpush3.bf16.msra.mxu1 %v3003_v12 }
 0x76c   : > { %2746 = vmatprep.subr.bf16.mxu0 %v3004_v13  ;;  %2768 = vmatprep.subr.bf16.mxu1 %v3005_v14  ;;  %v3018_v13 = vld [vmem:[%s3384_s20 + $0x110] sm:$0xff]  }
 0x76d   : > { %v3019_v14 = vld [vmem:[%s3384_s20 + $0x190] sm:$0xff]  }
 0x76f   : > { %2747 = vmatpush3.bf16.msra.mxu0 %v3006_v15  ;;  %2769 = vmatpush3.bf16.msra.mxu1 %v3007_v16  ;;  %v3020_v15 = vld [vmem:[%s3384_s20 + $0x158] sm:$0xff]  }
 0x770   : > { %2776 = vmatprep.subr.bf16.mxu0 %v3008_v17  ;;  %2798 = vmatprep.subr.bf16.mxu1 %v3009_v18  ;;  %v3021_v16 = vld [vmem:[%s3384_s20 + $0x1d8] sm:$0xff]  }
 0x771   : > { %v3022_v17 = vld [vmem:[%s3384_s20 + $0x118] sm:$0xff]  }
 0x772   : > { %v3023_v18 = vld [vmem:[%s3384_s20 + $0x198] sm:$0xff]  }
 0x81d   : > { %v1501_v29 = vpop.f32.mrb[20].mxu0  ;;  %v1542_v30 = vpop.f32.mrb[20].mxu1 }
 0x81e   : > { %v1502_v31 = vadd.f32 %v1501_v29, %v1347_v25  ;;  %v1543_v32 = vadd.f32 %v1542_v30, %v1355_v26  ;;  %v1503_v33 = vpop.f32.mrb[21].mxu0  ;;  %v1544_v34 = vpop.f32.mrb[21].mxu1  ;;  %v1370_v25 = vsub.s32 6, %v3561_v19  ;;  %v3028_v26 = vld [vmem:[%s3384_s20 + $0x168] sm:$0xff]   ;;  %v1363_v30 = vrot.slane %v3566_v22, %v1362_v24  ;;  %v3032_v19 = vld [vmem:[%s3384_s20 + $0x170] sm:$0xff]  }
 0x81f   : > { %v1504_v35 = vadd.f32 %v1503_v33, %v1351_v27  ;;  %v1545_v36 = vadd.f32 %v1544_v34, %v1359_v28  ;;  %v1505_v37 = vpop.f32.mrb[22].mxu0  ;;  %v1546_v38 = vpop.f32.mrb[22].mxu1  ;;  %v3029_v27 = vld [vmem:[%s3384_s20 + $0x1e8] sm:$0xff]   ;;  %v3034_v33 = vld [vmem:[%s3384_s20 + $0x130] sm:$0xff]  }
 0x820   : > { %v1631_v41 = vmax.f32 %v1502_v31, 0.0  ;;  %v1633_v43 = vmax.f32 %v1543_v32, 0.0  ;;  %v1506_v44 = vpop.f32.mrb[23].mxu0  ;;  %v1547_v45 = vpop.f32.mrb[23].mxu1  ;;  %v3030_v28 = vld [vmem:[%s3384_s20 + $0x128] sm:$0xff]   ;;  %v1371_v31 = vrot.slane %v3566_v22, %v1370_v25  ;;  %v3033_v32 = vld [vmem:[%s3384_s20 + $0x1f0] sm:$0xff]  }
 0x821   : > { %v1632_v46 = vmax.f32 %v1504_v35, 0.0  ;;  %v1634_v47 = vmax.f32 %v1545_v36, 0.0  ;;  %v3031_v29 = vld [vmem:[%s3384_s20 + $0x1a8] sm:$0xff]   ;;  %v3035_v34 = vld [vmem:[%s3384_s20 + $0x1b0] sm:$0xff]   ;;  %v3036_v37 = vld [vmem:[%s3384_s20 + $0x178] sm:$0xff]  }
 0x822   : > { %v1639_v53 = vpack.c.bf16 %v1631_v41, %v1631_v41  ;;  %v1641_v54 = vpack.c.bf16 %v1633_v43, %v1633_v43  ;;  %v3037_v38 = vld [vmem:[%s3384_s20 + $0x1f8] sm:$0xff]  }
 0x823   : > { %v1640_v48 = vpack.c.bf16 %v1632_v46, %v1632_v46  ;;  %v1642_v49 = vpack.c.bf16 %v1634_v47, %v1634_v47  ;;  %v3038_v22 = vld [vmem:[%s3384_s20 + $0x138] sm:$0xff]   ;;  %v2634_v47 = vld [vmem:[%s677_s28] ss:$0 sm:$0xff] }
 0x825   : > { %v3582_v57 = vpop.f32.mrb[24].mxu0  ;;  %v3584_v58 = vpop.f32.mrb[24].mxu1  ;;  %2198 = vmatprep.mubr.bf16.mxu0 %v1640_v48  ;;  %2238 = vmatprep.mubr.bf16.mxu1 %v1642_v49 }
 0x826   : > { %v1585_v59 = vpop.f32.mrb[25].mxu0  ;;  %v1626_v60 = vpop.f32.mrb[25].mxu1  ;;  %2199 = vmatmul.mubr.bf16.vlgmr.msra.gmra.mrb[28].mxu0 %v1639_v53  ;;  %2239 = vmatmul.mubr.bf16.vlgmr.msra.gmra.mrb[28].mxu1 %v1641_v54  ;;  %v1584_v35 = vadd.f32 %v3582_v57, %v1363_v30  ;;  %v1625_v36 = vadd.f32 %v3584_v58, %v1371_v31 }
 0x827   : > { %v1586_v61 = vadd.f32 %v1585_v59, %v1367_v50  ;;  %v1627_v62 = vadd.f32 %v1626_v60, %v1375_v2  ;;  %2777 = vmatpush3.bf16.msra.mxu0 %v3010_v51  ;;  %2799 = vmatpush3.bf16.msra.mxu1 %v3011_v52  ;;  %v1587_v63 = vpop.f32.mrb[26].mxu0  ;;  %v1628_v0 = vpop.f32.mrb[26].mxu1 }
 0x828   : > { %v1588_v5 = vpop.f32.mrb[27].mxu0  ;;  %v1629_v6 = vpop.f32.mrb[27].mxu1  ;;  %2778 = vmatprep.subr.bf16.mxu0 %v3012_v55  ;;  %2800 = vmatprep.subr.bf16.mxu1 %v3013_v56  ;;  %v1635_v40 = vmax.f32 %v1584_v35, 0.0  ;;  %v1637_v41 = vmax.f32 %v1625_v36, 0.0 }
 0x829   : > { %v1636_v9 = vmax.f32 %v1586_v61, 0.0  ;;  %v1638_v10 = vmax.f32 %v1627_v62, 0.0 }
 0x82a   : > { %v1643_v43 = vpack.c.bf16 %v1635_v40, %v1635_v40  ;;  %v1645_v44 = vpack.c.bf16 %v1637_v41, %v1637_v41 }
 0x82b   : > { %v1644_v4 = vpack.c.bf16 %v1636_v9, %v1636_v9  ;;  %v1646_v12 = vpack.c.bf16 %v1638_v10, %v1638_v10  ;;  %2779 = vmatpush3.bf16.msra.mxu0 %v3014_v1  ;;  %2801 = vmatpush3.bf16.msra.mxu1 %v3015_v3 }
 0x82c   : > { %2780 = vmatprep.subr.bf16.mxu0 %v3016_v7  ;;  %2802 = vmatprep.subr.bf16.mxu1 %v3017_v8 }
 0x82d   : > { %2278 = vmatprep.mubr.bf16.mxu0 %v1644_v4  ;;  %2318 = vmatprep.mubr.bf16.mxu1 %v1646_v12 }
 0x82f   : > { %2781 = vmatpush3.bf16.msra.mxu0 %v3018_v13  ;;  %2803 = vmatpush3.bf16.msra.mxu1 %v3019_v14 }
 0x830   : > { %2782 = vmatprep.subr.bf16.mxu0 %v3020_v15  ;;  %2804 = vmatprep.subr.bf16.mxu1 %v3021_v16 }
 0x833   : > { %2783 = vmatpush3.bf16.msra.mxu0 %v3022_v17  ;;  %2805 = vmatpush3.bf16.msra.mxu1 %v3023_v18 }
 0x834   : > { %2784 = vmatprep.subr.bf16.mxu0 %v3024_v11  ;;  %2806 = vmatprep.subr.bf16.mxu1 %v3025_v20  ;;  %v2700_v11 = vld [vmem:[%s683_s13] ss:$0 sm:$0xff] }
 0x837   : > { %2785 = vmatpush3.bf16.msra.mxu0 %v3026_v21  ;;  %2807 = vmatpush3.bf16.msra.mxu1 %v3027_v23 }
 0x838   : > { %2786 = vmatprep.subr.bf16.mxu0 %v3028_v26  ;;  %2808 = vmatprep.subr.bf16.mxu1 %v3029_v27 }
 0x83b   : > { %2787 = vmatpush3.bf16.msra.mxu0 %v3030_v28  ;;  %2809 = vmatpush3.bf16.msra.mxu1 %v3031_v29 }
 0x83c   : > { %2788 = vmatprep.subr.bf16.mxu0 %v3032_v19  ;;  %2810 = vmatprep.subr.bf16.mxu1 %v3033_v32 }
 0x83f   : > { %2789 = vmatpush3.bf16.msra.mxu0 %v3034_v33  ;;  %2811 = vmatpush3.bf16.msra.mxu1 %v3035_v34 }
 0x840   : > { %2790 = vmatprep.subr.bf16.mxu0 %v3036_v37  ;;  %2812 = vmatprep.subr.bf16.mxu1 %v3037_v38 }
 0x843   : > { %2791 = vmatpush3.bf16.msra.mxu0 %v3038_v22  ;;  %2813 = vmatpush3.bf16.msra.mxu1 %v3039_v39 }
 0x846   : > { %2279 = vmatmul.mubr.bf16.vlgmr.msra.gmra.mrb[32].mxu0 %v1643_v43  ;;  %2319 = vmatmul.mubr.bf16.vlgmr.msra.gmra.mrb[32].mxu1 %v1645_v44 }
 0x8f9   : > { %v2748_v45 = vpop.f32.mrb[28].mxu0  ;;  %v2770_v46 = vpop.f32.mrb[28].mxu1 }
 0x8fa   : > { %v2749_v48 = vpop.f32.mrb[29].mxu0  ;;  %v2771_v49 = vpop.f32.mrb[29].mxu1 }
 0x8fb   : > { %v2750_v50 = vadd.f32 %v2749_v48, %v2748_v45  ;;  %v2772_v2 = vadd.f32 %v2771_v49, %v2770_v46  ;;  %v2751_v51 = vpop.f32.mrb[30].mxu0  ;;  %v2773_v52 = vpop.f32.mrb[30].mxu1 }
 0x8fc   : > { %v2752_v53 = vpop.f32.mrb[31].mxu0  ;;  %v2774_v54 = vpop.f32.mrb[31].mxu1 }
 0x8fd   : > { %v2201_v55 = vadd.f32 %v2750_v50, %v2634_v47 }
 0x8ff   : > { %v2241_v56 = vadd.f32 %v2772_v2, %v2201_v55 }
 0x919   : > { %v2792_v57 = vpop.f32.mrb[32].mxu0  ;;  %v2814_v58 = vpop.f32.mrb[32].mxu1 }
 0x91a   : > { %v2793_v59 = vpop.f32.mrb[33].mxu0  ;;  %v2815_v60 = vpop.f32.mrb[33].mxu1 }
 0x91b   : > { %v2794_v61 = vadd.f32 %v2793_v59, %v2792_v57  ;;  %v2816_v62 = vadd.f32 %v2815_v60, %v2814_v58  ;;  %v2795_v63 = vpop.f32.mrb[34].mxu0  ;;  %v2817_v0 = vpop.f32.mrb[34].mxu1 }
 0x91c   : > { %v2796_v1 = vpop.f32.mrb[35].mxu0  ;;  %v2818_v3 = vpop.f32.mrb[35].mxu1 }
 0x91d   : > { %v2281_v5 = vadd.f32 %v2794_v61, %v2241_v56 }
 0x91f   : > { %v2321_v6 = vadd.f32 %v2816_v62, %v2281_v5 }
 0x921   : > { %v2326_v7 = vadd.f32 %v2321_v6, %v3519_v42  ;;  %v2699_v42 = vld [vmem:[%s680_s1] ss:$0 sm:$0xff] }
 0x923   : > { %v2329_v8 = vsel %vm717_vm2, %v2326_v7, 0.0 }
 0x924   : > { %2330 = vadd.xlane.f32.xlu0 %v2329_v8 }
 0x9b1   : > { %v2331_v9 = vpop.xlane.xlu0 %2330 }
 0x9b2   : > { %v2332_v10 = vmul.f32 0.03125, %v2331_v9 }
 0x9b4   : > { %v2333_v4 = vsub.f32 %v2326_v7, %v2332_v10 }
 0x9b6   : > { %v2334_v12 = vmul.f32 %v2333_v4, %v2333_v4 }
 0x9b8   : > { %v2335_v13 = vsel %vm717_vm2, %v2334_v12, 0.0 }
 0x9b9   : > { %2336 = vadd.xlane.f32.xlu0 %v2335_v13 }
 0xa46   : > { %v2337_v14 = vpop.xlane.xlu0 %2336 }
 0xa47   : > { %v2338_v15 = vmul.f32 0.03125, %v2337_v14 }
 0xa49   : > { %v2339_v16 = vadd.f32 1e-05, %v2338_v15 }
 0xa4b   : > { %3058 = vrsqrt.f32 %v2339_v16 }
 0xa55   : > { %v3059_v17 = vpop.eup %3058 }
 0xa56   : > { %v2341_v18 = vmul.f32 %v3059_v17, %v2333_v4  ;;  %2360 = sbr.rel (%p2701_p1) target bundleno = 2653 (0xa5d), region = 84 }
 0xa58   : > { %v2348_v20 = vmul.f32 %v2699_v42, %v2341_v18 }
 0xa5a   : > { %v2355_v21 = vadd.f32 %v2700_v11, %v2348_v20 }
 0xa5c   : > { %2356 = vst.msk [vmem:[#allocation2] sm:$0xff] %vm717_vm2, %v2355_v21  ;;  %2361 = vst.msk [vmem:[%s631_s30] sm:$0xff] (!%p2701_p1), %vm717_vm2, %v2355_v21 }
 0xa5d PF: > { %s3769_s25 = sld [smem:[#allocation10_spill]]  ;;  %s3770_s1 = sld [smem:[#allocation7_spill]] }
 0xa5e   : > { %s3772_s13 = sld [smem:[#allocation27_spill]]  ;;  %s2376_s19 = sshll.u32 %s631_s30, 4  ;;  %s2377_s19 = int_to_ptr.vmem [resolvable:$true] %s2376_s19 }
 0xa5f   : > { %s3060_s17 = scalar_lea.vmem %s2377_s19, 128  ;;  %s3173_s29 = smov [#allocation3]  }
 0xa60   : > { %p3061_p2 = scmp.ne.s32.totalorder %s2377_s19, %s3060_s17  ;;  %s3064_s18 = sshll.u32 %s3173_s29, 4  ;;  %s3065_s18 = int_to_ptr.vmem [resolvable:$false] %s3064_s18 }
 0xa61   : > { %s3066_s12 = scalar_lea.vmem %s3065_s18, 256  ;;  %p3067_p6 = scmp.lt.s32.totalorder %s2377_s19, %s3065_s18 }
 0xa62   : > { %p3062_p4 = pnand %p3061_p2, %p3298_p3  ;;  %p3068_p7 = scmp.lt.s32.totalorder %s3066_s12, %s3060_s17 }
 0xa63   : > { %s2703_s26 = sshll.u32 %s3769_s25, 7  ;;  %s3773_s14 = sand.u32 1, %s3770_s1  }
 0xa64   : > { %s3645_s15 = scalar_lea.hbm %s3772_s13, %s2703_s26  ;;  %s2363_s16 = scalar_lea.sflag [#allocation4], %s3773_s14 }
 0xa65   : > { %p3063_p5 = pneg %p3062_p4  ;;  %p3069_p8 = por %p3068_p7, %p3067_p6 }
 0xa67   : > { %p3070_p10 = pnand %p3069_p8, %p3063_p5 }
 0xa69   : > { %3073 = shalt.err (!%p3070_p10)
}
 0xa6a   : > { %s3074_s23 = scalar_lea.hbm %s3645_s15, 128  ;;  %s3078_s28 = scalar_lea.hbm %s3772_s13, 256 }
 0xa6b   : > { %p3075_p11 = scmp.ne.s32.totalorder %s3645_s15, %s3074_s23  ;;  %p3079_p0 = scmp.lt.u32.totalorder %s3645_s15, %s3772_s13 }
 0xa6c   : > { %p3080_p1 = scmp.lt.u32.totalorder %s3078_s28, %s3074_s23  ;;  %p3082_p4 = scmp.lt.u32.totalorder %s3074_s23, %s3645_s15 }
 0xa6d   : > { %p3076_p12 = pnand %p3075_p11, %p3298_p3 }
 0xa6e   : > { %p3081_p2 = por %p3080_p1, %p3079_p0 }
 0xa6f   : > { %p3077_p13 = pneg %p3076_p12 }
 0xa70   : > { %p3083_p5 = por %p3082_p4, %p3081_p2 }
 0xa72   : > { %p3084_p6 = pnand %p3083_p5, %p3077_p13 }
 0xa74   : > { %3087 = shalt.err (!%p3084_p6)
}
 0xa75   : > { %2884 = dma.vmem_to_hbm [thread:$0]  (%p3298_p3), %s2377_s19, 128, %s3645_s15, %s2363_s16  }
 0xa76 PF: > { %s3774_s2 = sld [smem:[#allocation13_spill]]  ;;  %s3775_s4 = sld [smem:[#allocation6_spill]] }
 0xa7c   : > { %p2890_p7 = scmp.ge.s32.totalorder %s3774_s2, 2  ;;  %s2388_s8 = sand.u32 1, %s3775_s4  }
 0xa7d   : > { %s2389_s25 = scalar_lea.sflag [#allocation4], %s2388_s8 }
 0xa7e   : > { %p2887_p8 = pnand %p2890_p7, %p3308_p9 }
 0xa80   : > { %3121 = dma.done.wait (!%p2887_p8), %s2389_s25, 128  }
 0xa81   : > { %3123 = vsyncadd (!%p2887_p8), %s2389_s25, 4294967168  ;;  %s27_s20 = sadd.s32 1, %s3774_s2   ;;  %s3777_s29 = sld [smem:[#allocation7_spill]] }
 0xa82   : > { %p24_p10 = scmp.ge.s32.totalorder %s27_s20, 6   ;;  %s3778_s30 = sld [smem:[#allocation8_spill]] }
 0xa83   : > { %s3779_s15 = sld [smem:[#allocation18_spill]]  ;;  %s3780_s16 = sld [smem:[#allocation11_spill]] }
 0xa84   : > { %s3781_s17 = sld [smem:[#allocation12_spill]]  ;;  %s3782_s18 = sld [smem:[#allocation14_spill]] }
 0xa85   : > { %s3783_s19 = sld [smem:[#allocation16_spill]]  ;;  %26 = sbr.rel (!%p24_p10) target bundleno = 15 (0xf), region = 158 }
 0xa8c   :  { %2394 = vsyncpa [#allocation4], 1 }
 0xa8d   :  { %2396 = vsyncpa [#allocation4 + $0x1], 1 }

</bundles_post_ra>
